<compile_context>
chip_gen: v6e
topology: v6e:2x2x1
jax: 0.10.0
libtpu: 0.0.40
codegen_flags: <defaults>
</compile_context>

<pallas_src>
import functools

import jax
import jax.numpy as jnp
from jax.experimental import pallas as pl
from jax.experimental.pallas import tpu as pltpu

EPS = 1e-5  # calc_mean_std default eps


# ----------------------------------------------------------------------------
# Fused Pallas kernel: one grid step == one batch element
# ----------------------------------------------------------------------------
def _attention_unit_kernel(fc_ref, fs_ref, w_in_ref, b_in_ref,
                           w_out_ref, b_out_ref, o_ref, *, hw, ch, q_chunk):
    fc = fc_ref[0].astype(jnp.float32)            # (C, HW) channels-first
    fs = fs_ref[0].astype(jnp.float32)            # (C, HW)

    def relu6(x):
        return jnp.clip(x, 0.0, 6.0)

    def mvn(x):
        # per-channel mean / unbiased variance over the spatial (lane) axis
        # (torch.Tensor.var default is unbiased -> divide by HW - 1).
        mu = jnp.mean(x, axis=1, keepdims=True)                  # (C, 1)
        d = x - mu
        var = jnp.sum(d * d, axis=1, keepdims=True) * (1.0 / (hw - 1))
        return d * jax.lax.rsqrt(var + EPS)

    # Fused input projections:  [f; g; h] = relu6(W_blk @ [mvn(fc); mvn(fs); fs] + b)
    x_cat = jnp.concatenate([mvn(fc), mvn(fs), fs], axis=0)      # (3C, HW) f32
    proj = jnp.dot(w_in_ref[...].astype(jnp.bfloat16),           # (3Ch, 3C)
                   x_cat.astype(jnp.bfloat16),
                   preferred_element_type=jnp.float32)           # (3Ch, HW) f32
    proj = relu6(proj + b_in_ref[...])                           # bias/relu6 in f32

    f = proj[0 * ch:1 * ch]                                      # (Ch, HW) f32
    g = proj[1 * ch:2 * ch].astype(jnp.bfloat16)                 # (Ch, HW)
    h = proj[2 * ch:3 * ch].astype(jnp.bfloat16)                 # (Ch, HW)

    # One small in-kernel reorientation (cheap XLU) so the logits matmul is a
    # plain (Q, Ch) @ (Ch, HW) with no transposed MXU feed.
    f_t = jnp.transpose(f).astype(jnp.bfloat16)                  # (HW, Ch)

    w_out = w_out_ref[...].astype(jnp.bfloat16)                  # (C, Ch)
    b_out = b_out_ref[...]                                       # (C, 1) f32

    # Query-row tiling: logits/attn never exceed (q_chunk, HW).
    for qi in range(hw // q_chunk):
        q0 = qi * q_chunk
        fq = f_t[q0:q0 + q_chunk]                                # (Q, Ch) bf16
        logits = jnp.dot(fq, g, preferred_element_type=jnp.float32)   # (Q, HW) f32
        m = jnp.max(logits, axis=-1, keepdims=True)
        p = jnp.exp(logits - m)
        s = jnp.sum(p, axis=-1, keepdims=True)
        attn = (p * pl.reciprocal(s, approx=True)).astype(jnp.bfloat16)  # (Q, HW)

        # Fcs[c, q] = sum_k h[c, k] * attn[q, k]   (contract both last dims)
        fcs = jax.lax.dot_general(h, attn, (((1,), (1,)), ((), ())),
                                  preferred_element_type=jnp.float32)   # (Ch, Q)

        out_q = relu6(jnp.dot(w_out, fcs.astype(jnp.bfloat16),
                              preferred_element_type=jnp.float32) + b_out)  # (C, Q)
        o_ref[0, :, q0:q0 + q_chunk] = out_q.astype(o_ref.dtype)  # lane-dense store


# ----------------------------------------------------------------------------
# Host-side param packing (done once, outside jit)
# ----------------------------------------------------------------------------
def pack_params(params):
    """PyTorch-layout 1x1-conv params -> packed kernel matrices."""
    wf, wg, wh = params["wf"], params["wg"], params["wh"]        # (Ch, C) each
    ch, c = wf.shape
    w_in = jnp.zeros((3 * ch, 3 * c), wf.dtype)                  # block-diag
    w_in = w_in.at[0 * ch:1 * ch, 0 * c:1 * c].set(wf)
    w_in = w_in.at[1 * ch:2 * ch, 1 * c:2 * c].set(wg)
    w_in = w_in.at[2 * ch:3 * ch, 2 * c:3 * c].set(wh)
    b_in = jnp.concatenate([params["bf"], params["bg"], params["bh"]]
                           ).reshape(3 * ch, 1)
    return dict(w_in=w_in, b_in=b_in,
                w_out=params["wo"],                              # (C, Ch)
                b_out=params["bo"].reshape(c, 1))                # (C, 1)


# ----------------------------------------------------------------------------
# Wrapper: NCHW in / NCHW out, single fused pallas_call, no HBM transposes
# ----------------------------------------------------------------------------
def attention_unit(fc, fs, packed):
    B, C, H, W = fc.shape
    HW = H * W
    Ch = packed["w_in"].shape[0] // 3

    fc_l = fc.reshape(B, C, HW)       # contiguous reshape only (free)
    fs_l = fs.reshape(B, C, HW)

    q_chunk = 128 if HW % 128 == 0 else HW
    kernel = functools.partial(_attention_unit_kernel,
                               hw=HW, ch=Ch, q_chunk=q_chunk)

    out = pl.pallas_call(
        kernel,
        out_shape=jax.ShapeDtypeStruct((B, C, HW), fc.dtype),
        grid=(B,),
        in_specs=[
            pl.BlockSpec((1, C, HW), lambda b: (b, 0, 0)),       # Fc (per batch)
            pl.BlockSpec((1, C, HW), lambda b: (b, 0, 0)),       # Fs (per batch)
            pl.BlockSpec((3 * Ch, 3 * C), lambda b: (0, 0)),     # block-diag Wf/Wg/Wh
            pl.BlockSpec((3 * Ch, 1), lambda b: (0, 0)),         # bf;bg;bh
            pl.BlockSpec((C, Ch), lambda b: (0, 0)),             # Wo
            pl.BlockSpec((C, 1), lambda b: (0, 0)),              # bo
        ],
        out_specs=pl.BlockSpec((1, C, HW), lambda b: (b, 0, 0)),  # lane-dense output
        compiler_params=pltpu.CompilerParams(
            dimension_semantics=("parallel",)),                   # megacore on v7x
    )(fc_l, fs_l, packed["w_in"], packed["b_in"],
      packed["w_out"], packed["b_out"])

    return out.reshape(B, C, H, W)    # contiguous reshape only (free)


# ----------------------------------------------------------------------------
# Pure-JAX reference (mirror of the PyTorch forward) for a correctness check
# ----------------------------------------------------------------------------
def _reference(fc, fs, params):
    B, C, H, W = fc.shape
    HW = H * W
    hi = jax.lax.Precision.HIGHEST

    def relu6(x):
        return jnp.clip(x, 0.0, 6.0)

    def mvn(x):
        xf = x.reshape(B, C, HW)
        mu = xf.mean(axis=2)
        var = xf.var(axis=2, ddof=1) + EPS
        return (x - mu[:, :, None, None]) / jnp.sqrt(var)[:, :, None, None]

    def conv1x1(x, w, b):   # w: (Cout, Cin) like torch Conv2d weight[:,:,0,0]
        return jnp.einsum("bchw,dc->bdhw", x, w, precision=hi) \
            + b[None, :, None, None]

    f_fc = relu6(conv1x1(mvn(fc), params["wf"], params["bf"]))
    g_fs = relu6(conv1x1(mvn(fs), params["wg"], params["bg"]))
    h_fs = relu6(conv1x1(fs, params["wh"], params["bh"]))

    f2 = f_fc.reshape(B, C // 2, HW).transpose(0, 2, 1)          # (B, HW, Ch)
    g2 = g_fs.reshape(B, C // 2, HW)                             # (B, Ch, HW)
    attn = jax.nn.softmax(jnp.einsum("bnc,bcm->bnm", f2, g2, precision=hi),
                          axis=-1)                               # (B, HW, HW)
    h2 = h_fs.reshape(B, C // 2, HW)
    fcs = jnp.einsum("bcm,bnm->bcn", h2, attn, precision=hi)     # (B, Ch, HW)
    fcs = fcs.reshape(B, C // 2, H, W)
    return relu6(conv1x1(fcs, params["wo"], params["bo"]))


# ----------------------------------------------------------------------------
# Deterministic parameter init (PyTorch orientation: weight (Cout, Cin))
# ----------------------------------------------------------------------------
def init_params(key, C):
    Ch = C // 2
    ks = jax.random.split(key, 8)
    s = 0.1
    return dict(
        wf=s * jax.random.normal(ks[0], (Ch, C), jnp.float32),
        bf=s * jax.random.normal(ks[1], (Ch,), jnp.float32),
        wg=s * jax.random.normal(ks[2], (Ch, C), jnp.float32),
        bg=s * jax.random.normal(ks[3], (Ch,), jnp.float32),
        wh=s * jax.random.normal(ks[4], (Ch, C), jnp.float32),
        bh=s * jax.random.normal(ks[5], (Ch,), jnp.float32),
        wo=s * jax.random.normal(ks[6], (C, Ch), jnp.float32),
        bo=s * jax.random.normal(ks[7], (C,), jnp.float32),
    )


# ----------------------------------------------------------------------------
# Main
# ----------------------------------------------------------------------------
if __name__ == "__main__":
    # AttentionUnit(channels=32) on (B, C, H, W) = (2, 32, 16, 16) inputs.
    B, C, H, W = 2, 32, 16, 16

    key = jax.random.PRNGKey(0)
    kc, ksy, kp = jax.random.split(key, 3)
    Fc = jax.random.normal(kc, (B, C, H, W), jnp.float32)
    Fs = jax.random.normal(ksy, (B, C, H, W), jnp.float32)
    params = init_params(kp, C)
    packed = pack_params(params)     # one-time host-side packing

    fwd = jax.jit(attention_unit)
    out = fwd(Fc, Fs, packed)
    jax.block_until_ready(out)

    assert out.shape == (B, C, H, W)
    assert bool(jnp.all(jnp.isfinite(out)))

    ref = _reference(Fc, Fs, params)
    err = float(jnp.max(jnp.abs(out - ref)))
    assert err < 3e-2, f"max abs err vs reference: {err}"

    print("KERNEL_OK")
</pallas_src>

<mosaic_0001>
module attributes {stable_mosaic.version = 11 : i64} {
  func.func @_attention_unit_kernel(%arg0: i32, %arg1: memref<1x32x256xf32, #tpu.memory_space<vmem>>, %arg2: memref<1x32x256xf32, #tpu.memory_space<vmem>>, %arg3: memref<48x96xf32, #tpu.memory_space<vmem>>, %arg4: memref<48x1xf32, #tpu.memory_space<vmem>>, %arg5: memref<32x16xf32, #tpu.memory_space<vmem>>, %arg6: memref<32x1xf32, #tpu.memory_space<vmem>>, %arg7: memref<1x32x256xf32, #tpu.memory_space<vmem>>) attributes {dimension_semantics = [#tpu.dimension_semantics<parallel>], iteration_bounds = array<i64: 2>, scalar_prefetch = 0 : i64, scratch_operands = 0 : i64, tpu.core_type = #tpu.core_type<tc>, window_params = [{transform_indices = @transform_0, window_bounds = array<i64: 1, 32, 256>}, {transform_indices = @transform_1, window_bounds = array<i64: 1, 32, 256>}, {pipeline_mode = #tpu.pipeline_mode<synchronous>, transform_indices = @transform_2, window_bounds = array<i64: 48, 96>}, {pipeline_mode = #tpu.pipeline_mode<synchronous>, transform_indices = @transform_3, window_bounds = array<i64: 48, 1>}, {pipeline_mode = #tpu.pipeline_mode<synchronous>, transform_indices = @transform_4, window_bounds = array<i64: 32, 16>}, {pipeline_mode = #tpu.pipeline_mode<synchronous>, transform_indices = @transform_5, window_bounds = array<i64: 32, 1>}, {transform_indices = @transform_6, window_bounds = array<i64: 1, 32, 256>}]} {
    %c0 = arith.constant 0 : index
    %c0_0 = arith.constant 0 : index
    %c0_1 = arith.constant 0 : index
    %0 = vector.load %arg1[%c0, %c0_0, %c0_1] : memref<1x32x256xf32, #tpu.memory_space<vmem>>, vector<1x32x256xf32>
    %1 = vector.shape_cast %0 : vector<1x32x256xf32> to vector<32x256xf32>
    %c0_2 = arith.constant 0 : index
    %c0_3 = arith.constant 0 : index
    %c0_4 = arith.constant 0 : index
    %2 = vector.load %arg2[%c0_2, %c0_3, %c0_4] : memref<1x32x256xf32, #tpu.memory_space<vmem>>, vector<1x32x256xf32>
    %3 = vector.shape_cast %2 : vector<1x32x256xf32> to vector<32x256xf32>
    %cst = arith.constant dense<0.000000e+00> : vector<32xf32>
    %4 = vector.multi_reduction <add>, %1, %cst [1] : vector<32x256xf32> to vector<32xf32>
    %5 = vector.shape_cast %4 : vector<32xf32> to vector<32x1xf32>
    %cst_5 = arith.constant 2.560000e+02 : f32
    %6 = vector.broadcast %cst_5 : f32 to vector<32x1xf32>
    %7 = arith.divf %5, %6 : vector<32x1xf32>
    %8 = vector.broadcast %7 : vector<32x1xf32> to vector<32x256xf32>
    %9 = arith.subf %1, %8 : vector<32x256xf32>
    %10 = arith.mulf %9, %9 : vector<32x256xf32>
    %cst_6 = arith.constant dense<0.000000e+00> : vector<32xf32>
    %11 = vector.multi_reduction <add>, %10, %cst_6 [1] : vector<32x256xf32> to vector<32xf32>
    %12 = vector.shape_cast %11 : vector<32xf32> to vector<32x1xf32>
    %cst_7 = arith.constant 0.00392156886 : f32
    %13 = vector.broadcast %cst_7 : f32 to vector<32x1xf32>
    %14 = arith.mulf %12, %13 : vector<32x1xf32>
    %cst_8 = arith.constant 9.99999974E-6 : f32
    %15 = vector.broadcast %cst_8 : f32 to vector<32x1xf32>
    %16 = arith.addf %14, %15 : vector<32x1xf32>
    %17 = math.rsqrt %16 : vector<32x1xf32>
    %18 = vector.broadcast %17 : vector<32x1xf32> to vector<32x256xf32>
    %19 = arith.mulf %9, %18 : vector<32x256xf32>
    %cst_9 = arith.constant dense<0.000000e+00> : vector<32xf32>
    %20 = vector.multi_reduction <add>, %3, %cst_9 [1] : vector<32x256xf32> to vector<32xf32>
    %21 = vector.shape_cast %20 : vector<32xf32> to vector<32x1xf32>
    %cst_10 = arith.constant 2.560000e+02 : f32
    %22 = vector.broadcast %cst_10 : f32 to vector<32x1xf32>
    %23 = arith.divf %21, %22 : vector<32x1xf32>
    %24 = vector.broadcast %23 : vector<32x1xf32> to vector<32x256xf32>
    %25 = arith.subf %3, %24 : vector<32x256xf32>
    %26 = arith.mulf %25, %25 : vector<32x256xf32>
    %cst_11 = arith.constant dense<0.000000e+00> : vector<32xf32>
    %27 = vector.multi_reduction <add>, %26, %cst_11 [1] : vector<32x256xf32> to vector<32xf32>
    %28 = vector.shape_cast %27 : vector<32xf32> to vector<32x1xf32>
    %cst_12 = arith.constant 0.00392156886 : f32
    %29 = vector.broadcast %cst_12 : f32 to vector<32x1xf32>
    %30 = arith.mulf %28, %29 : vector<32x1xf32>
    %cst_13 = arith.constant 9.99999974E-6 : f32
    %31 = vector.broadcast %cst_13 : f32 to vector<32x1xf32>
    %32 = arith.addf %30, %31 : vector<32x1xf32>
    %33 = math.rsqrt %32 : vector<32x1xf32>
    %34 = vector.broadcast %33 : vector<32x1xf32> to vector<32x256xf32>
    %35 = arith.mulf %25, %34 : vector<32x256xf32>
    %36 = tpu.concatenate %19, %35, %3 in 0 : vector<32x256xf32>, vector<32x256xf32>, vector<32x256xf32> -> vector<96x256xf32>
    %c0_14 = arith.constant 0 : index
    %c0_15 = arith.constant 0 : index
    %37 = vector.load %arg3[%c0_14, %c0_15] : memref<48x96xf32, #tpu.memory_space<vmem>>, vector<48x96xf32>
    %38 = arith.truncf %37 : vector<48x96xf32> to vector<48x96xbf16>
    %39 = arith.truncf %36 : vector<96x256xf32> to vector<96x256xbf16>
    %cst_16 = arith.constant dense<0.000000e+00> : vector<48x256xf32>
    %40 = tpu.matmul %38, %39, %cst_16 {dimension_numbers = #tpu.dot_dimension_numbers<[1], [0], [0], [1], [0, 0, 1, 1], [], []>} : vector<48x96xbf16>, vector<96x256xbf16>, vector<48x256xf32> -> vector<48x256xf32>
    %c0_17 = arith.constant 0 : index
    %c0_18 = arith.constant 0 : index
    %41 = vector.load %arg4[%c0_17, %c0_18] : memref<48x1xf32, #tpu.memory_space<vmem>>, vector<48x1xf32>
    %42 = vector.broadcast %41 : vector<48x1xf32> to vector<48x256xf32>
    %43 = arith.addf %40, %42 : vector<48x256xf32>
    %cst_19 = arith.constant 0.000000e+00 : f32
    %cst_20 = arith.constant 6.000000e+00 : f32
    %44 = vector.broadcast %cst_19 : f32 to vector<48x256xf32>
    %45 = arith.maximumf %44, %43 : vector<48x256xf32>
    %46 = vector.broadcast %cst_20 : f32 to vector<48x256xf32>
    %47 = arith.minimumf %46, %45 : vector<48x256xf32>
    %48 = vector.extract_strided_slice %47 {offsets = [0, 0], sizes = [16, 256], strides = [1, 1]} : vector<48x256xf32> to vector<16x256xf32>
    %49 = vector.extract_strided_slice %47 {offsets = [16, 0], sizes = [16, 256], strides = [1, 1]} : vector<48x256xf32> to vector<16x256xf32>
    %50 = arith.truncf %49 : vector<16x256xf32> to vector<16x256xbf16>
    %51 = vector.extract_strided_slice %47 {offsets = [32, 0], sizes = [16, 256], strides = [1, 1]} : vector<48x256xf32> to vector<16x256xf32>
    %52 = arith.truncf %51 : vector<16x256xf32> to vector<16x256xbf16>
    %53 = tpu.transpose %48, [1, 0] : vector<16x256xf32> -> vector<256x16xf32>
    %54 = arith.truncf %53 : vector<256x16xf32> to vector<256x16xbf16>
    %c0_21 = arith.constant 0 : index
    %c0_22 = arith.constant 0 : index
    %55 = vector.load %arg5[%c0_21, %c0_22] : memref<32x16xf32, #tpu.memory_space<vmem>>, vector<32x16xf32>
    %56 = arith.truncf %55 : vector<32x16xf32> to vector<32x16xbf16>
    %c0_23 = arith.constant 0 : index
    %c0_24 = arith.constant 0 : index
    %57 = vector.load %arg6[%c0_23, %c0_24] : memref<32x1xf32, #tpu.memory_space<vmem>>, vector<32x1xf32>
    %58 = vector.extract_strided_slice %54 {offsets = [0, 0], sizes = [128, 16], strides = [1, 1]} : vector<256x16xbf16> to vector<128x16xbf16>
    %cst_25 = arith.constant dense<0.000000e+00> : vector<128x256xf32>
    %59 = tpu.matmul %58, %50, %cst_25 {dimension_numbers = #tpu.dot_dimension_numbers<[1], [0], [0], [1], [0, 0, 1, 1], [], []>} : vector<128x16xbf16>, vector<16x256xbf16>, vector<128x256xf32> -> vector<128x256xf32>
    %cst_26 = arith.constant dense<0xFF800000> : vector<128xf32>
    %60 = vector.multi_reduction <maximumf>, %59, %cst_26 [1] : vector<128x256xf32> to vector<128xf32>
    %61 = vector.shape_cast %60 : vector<128xf32> to vector<128x1xf32>
    %62 = vector.broadcast %61 : vector<128x1xf32> to vector<128x256xf32>
    %63 = arith.subf %59, %62 : vector<128x256xf32>
    %64 = math.exp %63 : vector<128x256xf32>
    %cst_27 = arith.constant dense<0.000000e+00> : vector<128xf32>
    %65 = vector.multi_reduction <add>, %64, %cst_27 [1] : vector<128x256xf32> to vector<128xf32>
    %66 = vector.shape_cast %65 : vector<128xf32> to vector<128x1xf32>
    %67 = tpu.reciprocal %66 {approx = true} : vector<128x1xf32> -> vector<128x1xf32>
    %68 = vector.broadcast %67 : vector<128x1xf32> to vector<128x256xf32>
    %69 = arith.mulf %64, %68 : vector<128x256xf32>
    %70 = arith.truncf %69 : vector<128x256xf32> to vector<128x256xbf16>
    %cst_28 = arith.constant dense<0.000000e+00> : vector<16x128xf32>
    %71 = tpu.matmul %52, %70, %cst_28 {dimension_numbers = #tpu.dot_dimension_numbers<[1], [1], [0], [0], [0, 0, 1, 0], [], []>} : vector<16x256xbf16>, vector<128x256xbf16>, vector<16x128xf32> -> vector<16x128xf32>
    %72 = arith.truncf %71 : vector<16x128xf32> to vector<16x128xbf16>
    %cst_29 = arith.constant dense<0.000000e+00> : vector<32x128xf32>
    %73 = tpu.matmul %56, %72, %cst_29 {dimension_numbers = #tpu.dot_dimension_numbers<[1], [0], [0], [1], [0, 0, 1, 1], [], []>} : vector<32x16xbf16>, vector<16x128xbf16>, vector<32x128xf32> -> vector<32x128xf32>
    %74 = vector.broadcast %57 : vector<32x1xf32> to vector<32x128xf32>
    %75 = arith.addf %73, %74 : vector<32x128xf32>
    %cst_30 = arith.constant 0.000000e+00 : f32
    %cst_31 = arith.constant 6.000000e+00 : f32
    %76 = vector.broadcast %cst_30 : f32 to vector<32x128xf32>
    %77 = arith.maximumf %76, %75 : vector<32x128xf32>
    %78 = vector.broadcast %cst_31 : f32 to vector<32x128xf32>
    %79 = arith.minimumf %78, %77 : vector<32x128xf32>
    %c0_32 = arith.constant 0 : index
    %c0_33 = arith.constant 0 : index
    %c0_34 = arith.constant 0 : index
    %80 = vector.load %arg7[%c0_32, %c0_33, %c0_34] : memref<1x32x256xf32, #tpu.memory_space<vmem>>, vector<1x32x128xf32>
    %81 = vector.shape_cast %80 : vector<1x32x128xf32> to vector<32x128xf32>
    %82 = vector.shape_cast %79 : vector<32x128xf32> to vector<1x32x128xf32>
    tpu.vector_store %arg7[%c0_32, %c0_33, %c0_34], %82 {strides = array<i32>} : memref<1x32x256xf32, #tpu.memory_space<vmem>>, vector<1x32x128xf32>,
    %83 = vector.extract_strided_slice %54 {offsets = [128, 0], sizes = [128, 16], strides = [1, 1]} : vector<256x16xbf16> to vector<128x16xbf16>
    %cst_35 = arith.constant dense<0.000000e+00> : vector<128x256xf32>
    %84 = tpu.matmul %83, %50, %cst_35 {dimension_numbers = #tpu.dot_dimension_numbers<[1], [0], [0], [1], [0, 0, 1, 1], [], []>} : vector<128x16xbf16>, vector<16x256xbf16>, vector<128x256xf32> -> vector<128x256xf32>
    %cst_36 = arith.constant dense<0xFF800000> : vector<128xf32>
    %85 = vector.multi_reduction <maximumf>, %84, %cst_36 [1] : vector<128x256xf32> to vector<128xf32>
    %86 = vector.shape_cast %85 : vector<128xf32> to vector<128x1xf32>
    %87 = vector.broadcast %86 : vector<128x1xf32> to vector<128x256xf32>
    %88 = arith.subf %84, %87 : vector<128x256xf32>
    %89 = math.exp %88 : vector<128x256xf32>
    %cst_37 = arith.constant dense<0.000000e+00> : vector<128xf32>
    %90 = vector.multi_reduction <add>, %89, %cst_37 [1] : vector<128x256xf32> to vector<128xf32>
    %91 = vector.shape_cast %90 : vector<128xf32> to vector<128x1xf32>
    %92 = tpu.reciprocal %91 {approx = true} : vector<128x1xf32> -> vector<128x1xf32>
    %93 = vector.broadcast %92 : vector<128x1xf32> to vector<128x256xf32>
    %94 = arith.mulf %89, %93 : vector<128x256xf32>
    %95 = arith.truncf %94 : vector<128x256xf32> to vector<128x256xbf16>
    %cst_38 = arith.constant dense<0.000000e+00> : vector<16x128xf32>
    %96 = tpu.matmul %52, %95, %cst_38 {dimension_numbers = #tpu.dot_dimension_numbers<[1], [1], [0], [0], [0, 0, 1, 0], [], []>} : vector<16x256xbf16>, vector<128x256xbf16>, vector<16x128xf32> -> vector<16x128xf32>
    %97 = arith.truncf %96 : vector<16x128xf32> to vector<16x128xbf16>
    %cst_39 = arith.constant dense<0.000000e+00> : vector<32x128xf32>
    %98 = tpu.matmul %56, %97, %cst_39 {dimension_numbers = #tpu.dot_dimension_numbers<[1], [0], [0], [1], [0, 0, 1, 1], [], []>} : vector<32x16xbf16>, vector<16x128xbf16>, vector<32x128xf32> -> vector<32x128xf32>
    %99 = vector.broadcast %57 : vector<32x1xf32> to vector<32x128xf32>
    %100 = arith.addf %98, %99 : vector<32x128xf32>
    %cst_40 = arith.constant 0.000000e+00 : f32
    %cst_41 = arith.constant 6.000000e+00 : f32
    %101 = vector.broadcast %cst_40 : f32 to vector<32x128xf32>
    %102 = arith.maximumf %101, %100 : vector<32x128xf32>
    %103 = vector.broadcast %cst_41 : f32 to vector<32x128xf32>
    %104 = arith.minimumf %103, %102 : vector<32x128xf32>
    %c0_42 = arith.constant 0 : index
    %c0_43 = arith.constant 0 : index
    %c128 = arith.constant 128 : index
    %105 = vector.load %arg7[%c0_42, %c0_43, %c128] : memref<1x32x256xf32, #tpu.memory_space<vmem>>, vector<1x32x128xf32>
    %106 = vector.shape_cast %105 : vector<1x32x128xf32> to vector<32x128xf32>
    %107 = vector.shape_cast %104 : vector<32x128xf32> to vector<1x32x128xf32>
    tpu.vector_store %arg7[%c0_42, %c0_43, %c128], %107 {strides = array<i32>} : memref<1x32x256xf32, #tpu.memory_space<vmem>>, vector<1x32x128xf32>,
    return
  }
  func.func @transform_0(%arg0: i32) -> (i32, i32, i32) {
    %c0_i32 = arith.constant 0 : i32
    %c0_i32_0 = arith.constant 0 : i32
    %c0_i32_1 = arith.constant 0 : i32
    return %arg0, %c0_i32, %c0_i32_0 : i32, i32, i32
  }
  func.func @transform_1(%arg0: i32) -> (i32, i32, i32) {
    %c0_i32 = arith.constant 0 : i32
    %c0_i32_0 = arith.constant 0 : i32
    %c0_i32_1 = arith.constant 0 : i32
    return %arg0, %c0_i32, %c0_i32_0 : i32, i32, i32
  }
  func.func @transform_2(%arg0: i32) -> (i32, i32) {
    %c0_i32 = arith.constant 0 : i32
    %c0_i32_0 = arith.constant 0 : i32
    %c0_i32_1 = arith.constant 0 : i32
    return %c0_i32, %c0_i32_0 : i32, i32
  }
  func.func @transform_3(%arg0: i32) -> (i32, i32) {
    %c0_i32 = arith.constant 0 : i32
    %c0_i32_0 = arith.constant 0 : i32
    %c0_i32_1 = arith.constant 0 : i32
    return %c0_i32, %c0_i32_0 : i32, i32
  }
  func.func @transform_4(%arg0: i32) -> (i32, i32) {
    %c0_i32 = arith.constant 0 : i32
    %c0_i32_0 = arith.constant 0 : i32
    %c0_i32_1 = arith.constant 0 : i32
    return %c0_i32, %c0_i32_0 : i32, i32
  }
  func.func @transform_5(%arg0: i32) -> (i32, i32) {
    %c0_i32 = arith.constant 0 : i32
    %c0_i32_0 = arith.constant 0 : i32
    %c0_i32_1 = arith.constant 0 : i32
    return %c0_i32, %c0_i32_0 : i32, i32
  }
  func.func @transform_6(%arg0: i32) -> (i32, i32, i32) {
    %c0_i32 = arith.constant 0 : i32
    %c0_i32_0 = arith.constant 0 : i32
    %c0_i32_1 = arith.constant 0 : i32
    return %arg0, %c0_i32, %c0_i32_0 : i32, i32, i32
  }
}

</mosaic_0001>

<bundles_post_ra>
// kernel: attention_unit.1
= control target key start
LH: loop header
LB: loop body
LE: loop exit
PB: predicated region body
PF: predicated region fallthrough
CT: control target
= control target key end

     0   :  { %s2085_s21 = smov 0   ;;  %s2860_s0 = inlined_call_operand.vmem [shape: f32[2,32,256], index: 0, kind: input, shape index: {}]   ;;  %s2861_s1 = inlined_call_operand.vmem [shape: f32[2,32,256], index: 1, kind: input, shape index: {}]   ;;  %s2862_s2 = inlined_call_operand.vmem [shape: f32[48,96], index: 2, kind: input, shape index: {}]   ;;  %s2863_s3 = inlined_call_operand.vmem [shape: f32[48,1], index: 3, kind: input, shape index: {}]   ;;  %s2864_s4 = inlined_call_operand.vmem [shape: f32[32,16], index: 4, kind: input, shape index: {}]   ;;  %s2865_s5 = inlined_call_operand.vmem [shape: f32[32,1], index: 5, kind: input, shape index: {}]   ;;  %s2866_s6 = inlined_call_operand.vmem [shape: f32[2,32,256], index: 6, kind: output, shape index: {}]  }
   0x1 LB: > { %s1752_s22 = sadd.s32 4294967295, %s2047_s21   ;;  %p1756_p0 = scmp.ge.s32.totalorder %s2047_s21, 1  ;;  %s2047_s21 = sphi %s2085_s21, %s16_s21  }
   0x2   : > { %p222_p1 = scmp.lt.s32.totalorder %s2047_s21, 3 }
   0x4   : > { %p223_p2 = pnand %p1756_p0, %p222_p1 }
   0x5   : > { %p257_p3 = scmp.lt.s32.totalorder (!%p223_p2), %s1752_s22, 1 }
   0x6   : > { %226 = sbr.rel (%p223_p2) target bundleno = 2565 (0xa05), region = 44 }
   0xb   : > { %s2868_s22 = smov (!%p257_p3, %s1752_s22), 1  ;;  %vm475_vm0 = vcmask 785408   ;;  %vm666_vm1 = vcmask 130048  }
   0xc   : > { %s2093_s23 = sshll.u32 %s2868_s22, 6 }
   0xd   : > { %s266_s26 = scalar_lea.vmem %s2861_s1, %s2093_s23  ;;  %s261_s29 = scalar_lea.vmem %s2860_s0, %s2093_s23 }
   0xe   : > { %v2099_v0 = vld [vmem:[%s266_s26 + $0x20] sm:$0xff]  ;;  %v2101_v1 = vld [vmem:[%s266_s26 + $0x28] sm:$0xff]  ;;  %v2103_v2 = vld [vmem:[%s266_s26 + $0x30] sm:$0xff]  ;;  %s2834_s28 = scalar_lea.vmem %s2866_s6, %s2093_s23 }
   0xf   : > { %v360_v3 = vadd.f32 %v2101_v1, %v2099_v0  ;;  %v2107_v4 = vld [vmem:[%s266_s26 + $0x38] sm:$0xff]  ;;  %v2109_v5 = vld [vmem:[%s266_s26] sm:$0xff]  ;;  %v2111_v6 = vld [vmem:[%s266_s26 + $0x8] sm:$0xff] }
  0x10   : > { %v354_v7 = vadd.f32 %v2111_v6, %v2109_v5  ;;  %v2119_v8 = vld [vmem:[%s266_s26 + $0x10] sm:$0xff]  ;;  %v2121_v9 = vld [vmem:[%s266_s26 + $0x18] sm:$0xff]  ;;  %v363_v10 = vadd.f32 %v2107_v4, %v2103_v2  ;;  %v277_v12 = vld [vmem:[%s261_s29 + $0x20] sm:$0xff] }
  0x11   : > { %361 = vadd.xlane.f32.xlu0 %v360_v3  ;;  %v357_v11 = vadd.f32 %v2121_v9, %v2119_v8  ;;  %v278_v13 = vld [vmem:[%s261_s29 + $0x28] sm:$0xff]  ;;  %v279_v14 = vld [vmem:[%s261_s29 + $0x30] sm:$0xff]  ;;  %v280_v15 = vld [vmem:[%s261_s29 + $0x38] sm:$0xff] }
  0x12   : > { %355 = vadd.xlane.f32.xlu1 %v354_v7  ;;  %v295_v16 = vadd.f32 %v278_v13, %v277_v12  ;;  %v298_v17 = vadd.f32 %v280_v15, %v279_v14  ;;  %v273_v18 = vld [vmem:[%s261_s29] sm:$0xff]  ;;  %v274_v19 = vld [vmem:[%s261_s29 + $0x8] sm:$0xff]  ;;  %v275_v20 = vld [vmem:[%s261_s29 + $0x10] sm:$0xff] }
  0x13   : > { %v276_v21 = vld [vmem:[%s261_s29 + $0x18] sm:$0xff]  ;;  %v289_v22 = vadd.f32 %v274_v19, %v273_v18 }
  0x14   : > { %v292_v23 = vadd.f32 %v276_v21, %v275_v20 }
  0x15   : > { %364 = vadd.xlane.f32.xlu0 %v363_v10 }
  0x16   : > { %358 = vadd.xlane.f32.xlu1 %v357_v11 }
  0x19   : > { %296 = vadd.xlane.f32.xlu0 %v295_v16 }
  0x1a   : > { %299 = vadd.xlane.f32.xlu1 %v298_v17 }
  0x1d   : > { %290 = vadd.xlane.f32.xlu0 %v289_v22 }
  0x1e   : > { %293 = vadd.xlane.f32.xlu1 %v292_v23 }
  0x9a   : > { %v362_v24 = vpop.xlane.xlu0 %361 }
  0x9b   : > { %v368_v25 = vmul.f32 0.00390625, %v362_v24  ;;  %v356_v26 = vpop.xlane.xlu1 %355 }
  0x9c   : > { %v366_v27 = vmul.f32 0.00390625, %v356_v26  ;;  %v436_v26 = vpack.c.bf16 %v2121_v9, %v2111_v6 }
  0x9d   : > { %v2128_v28 = vsub.f32 %v2099_v0, %v368_v25  ;;  %v2131_v29 = vsub.f32 %v2101_v1, %v368_v25  ;;  %v437_v25 = vpack.c.bf16 %v2103_v2, %v2099_v0  ;;  %v440_v0 = vld [vmem:[%s2863_s3 + $0x8] sm:$0xff] }
  0x9e   : > { %v365_v30 = vpop.xlane.xlu0 %364  ;;  %v2134_v31 = vsub.f32 %v2109_v5, %v366_v27  ;;  %v2137_v32 = vsub.f32 %v2111_v6, %v366_v27  ;;  %v435_v27 = vpack.c.bf16 %v2119_v8, %v2109_v5 }
  0x9f   : > { %v369_v33 = vmul.f32 0.00390625, %v365_v30  ;;  %v359_v34 = vpop.xlane.xlu1 %358  ;;  %v382_v35 = vmul.f32 %v2128_v28, %v2128_v28  ;;  %v383_v36 = vmul.f32 %v2131_v29, %v2131_v29  ;;  %v2049_v30 = vmov 0  }
  0xa0   : > { %v367_v37 = vmul.f32 0.00390625, %v359_v34  ;;  %v378_v38 = vmul.f32 %v2134_v31, %v2134_v31  ;;  %v379_v39 = vmul.f32 %v2137_v32, %v2137_v32  ;;  %517 = vmatprep.mubr.bf16.mxu0 %v2049_v30  ;;  %527 = vmatprep.mubr.bf16.mxu1 %v2049_v30 }
  0xa1   : > { %v2148_v40 = vsub.f32 %v2103_v2, %v369_v33  ;;  %v2151_v41 = vsub.f32 %v2107_v4, %v369_v33  ;;  %v392_v42 = vadd.f32 %v383_v36, %v382_v35  ;;  %1832 = vset.pattern.permute.xlu1 %v2049_v30  ;;  %1831 = vset.pattern.permute.xlu0 %v2049_v30  ;;  %v441_v2 = vld [vmem:[%s2863_s3 + $0x10] sm:$0xff] }
  0xa2   : > { %v2154_v43 = vsub.f32 %v2119_v8, %v367_v37  ;;  %v2157_v44 = vsub.f32 %v2121_v9, %v367_v37  ;;  %v297_v45 = vpop.xlane.xlu0 %296  ;;  %v386_v50 = vadd.f32 %v379_v39, %v378_v38 }
  0xa3   : > { %v304_v46 = vmul.f32 0.00390625, %v297_v45  ;;  %393 = vadd.xlane.f32.xlu0 %v392_v42  ;;  %v300_v47 = vpop.xlane.xlu1 %299  ;;  %v384_v48 = vmul.f32 %v2148_v40, %v2148_v40  ;;  %v385_v49 = vmul.f32 %v2151_v41, %v2151_v41 }
  0xa4   : > { %v305_v51 = vmul.f32 0.00390625, %v300_v47  ;;  %v380_v52 = vmul.f32 %v2154_v43, %v2154_v43  ;;  %v381_v53 = vmul.f32 %v2157_v44, %v2157_v44 }
  0xa5   : > { %v2167_v54 = vsub.f32 %v277_v12, %v304_v46  ;;  %v2169_v55 = vsub.f32 %v278_v13, %v304_v46  ;;  %v395_v56 = vadd.f32 %v385_v49, %v384_v48 }
  0xa6   : > { %v2171_v57 = vsub.f32 %v279_v14, %v305_v51  ;;  %v2173_v58 = vsub.f32 %v280_v15, %v305_v51  ;;  %v291_v59 = vpop.xlane.xlu0 %290  ;;  %v389_v62 = vadd.f32 %v381_v53, %v380_v52 }
  0xa7   : > { %v302_v60 = vmul.f32 0.00390625, %v291_v59  ;;  %396 = vadd.xlane.f32.xlu1 %v395_v56  ;;  %387 = vadd.xlane.f32.xlu0 %v386_v50  ;;  %v294_v61 = vpop.xlane.xlu1 %293  ;;  %v318_v63 = vmul.f32 %v2167_v54, %v2167_v54  ;;  %v319_v3 = vmul.f32 %v2169_v55, %v2169_v55 }
  0xa8   : > { %v303_v7 = vmul.f32 0.00390625, %v294_v61  ;;  %v320_v10 = vmul.f32 %v2171_v57, %v2171_v57  ;;  %v321_v11 = vmul.f32 %v2173_v58, %v2173_v58 }
  0xa9   : > { %v2183_v12 = vsub.f32 %v273_v18, %v302_v60  ;;  %v2185_v13 = vsub.f32 %v274_v19, %v302_v60  ;;  %v328_v14 = vadd.f32 %v319_v3, %v318_v63 }
  0xaa   : > { %v2187_v15 = vsub.f32 %v275_v20, %v303_v7  ;;  %v2189_v16 = vsub.f32 %v276_v21, %v303_v7  ;;  %v331_v17 = vadd.f32 %v321_v11, %v320_v10  ;;  %v438_v21 = vpack.c.bf16 %v2107_v4, %v2101_v1  ;;  %v439_v1 = vld [vmem:[%s2863_s3] sm:$0xff]  ;;  %v442_v4 = vld [vmem:[%s2863_s3 + $0x18] sm:$0xff] }
  0xab   : > { %390 = vadd.xlane.f32.xlu1 %v389_v62  ;;  %329 = vadd.xlane.f32.xlu0 %v328_v14  ;;  %v314_v22 = vmul.f32 %v2183_v12, %v2183_v12  ;;  %v315_v23 = vmul.f32 %v2185_v13, %v2185_v13 }
  0xac   : > { %v316_v18 = vmul.f32 %v2187_v15, %v2187_v15  ;;  %v317_v19 = vmul.f32 %v2189_v16, %v2189_v16  ;;  %489 = vmatprep.subr.bf16.mxu0 %v438_v21  ;;  %1809 = vmatprep.subr.bf16.mxu1 %v438_v21 }
  0xad   : > { %v322_v24 = vadd.f32 %v315_v23, %v314_v22  ;;  %490 = vmatpush1.bf16.msra.mxu0 %v437_v25  ;;  %1815 = vmatpush1.bf16.msra.mxu1 %v437_v25 }
  0xae   : > { %v325_v20 = vadd.f32 %v317_v19, %v316_v18  ;;  %491 = vmatprep.subr.bf16.mxu0 %v436_v26  ;;  %1810 = vmatprep.subr.bf16.mxu1 %v436_v26 }
  0xaf   : > { %332 = vadd.xlane.f32.xlu1 %v331_v17  ;;  %323 = vadd.xlane.f32.xlu0 %v322_v24 }
  0xb1   : > { %492 = vmatpush1.bf16.msra.mxu0 %v435_v27  ;;  %1816 = vmatpush1.bf16.msra.mxu1 %v435_v27 }
  0xb3   : > { %326 = vadd.xlane.f32.xlu1 %v325_v20 }
  0xc4   : > { %452 = vperm.xlu1 %1832, %v440_v0  }
  0xc5   : > { %447 = vperm.xlu0 %1831, %v439_v1  }
  0xc8   : > { %457 = vperm.xlu1 %1832, %v441_v2  }
  0xcc   : > { %462 = vperm.xlu1 %1832, %v442_v4   ;;  %v422_v4 = vld [vmem:[%s2862_s2 + $0x20] sm:$0xff] }
 0x12c   : > { %v394_v5 = vpop.xlane.xlu0 %393 }
 0x12d   : > { %v400_v6 = vmul.f32 0.003921569, %v394_v5  ;;  %v423_v5 = vld [vmem:[%s2862_s2 + $0x28] sm:$0xff] }
 0x12f   : > { %v404_v8 = vadd.f32 1e-05, %v400_v6  ;;  %v426_v6 = vpack.c.bf16 %v423_v5, %v422_v4 }
 0x130   : > { %v397_v9 = vpop.xlane.xlu1 %396  ;;  %v388_v33 = vpop.xlane.xlu0 %387 }
 0x131   : > { %v401_v34 = vmul.f32 0.003921569, %v397_v9  ;;  %v398_v35 = vmul.f32 0.003921569, %v388_v33  ;;  %1833 = vrsqrt.f32 %v404_v8 }
 0x133   : > { %v405_v36 = vadd.f32 1e-05, %v401_v34  ;;  %v402_v37 = vadd.f32 1e-05, %v398_v35 }
 0x134   : > { %v391_v38 = vpop.xlane.xlu1 %390  ;;  %v330_v39 = vpop.xlane.xlu0 %329 }
 0x135   : > { %1835 = vrsqrt.f32 %v405_v36  ;;  %v399_v42 = vmul.f32 0.003921569, %v391_v38  ;;  %v336_v45 = vmul.f32 0.003921569, %v330_v39 }
 0x136   : > { %1837 = vrsqrt.f32 %v402_v37 }
 0x137   : > { %v403_v46 = vadd.f32 1e-05, %v399_v42  ;;  %v340_v47 = vadd.f32 1e-05, %v336_v45 }
 0x138   : > { %v333_v48 = vpop.xlane.xlu1 %332  ;;  %v324_v49 = vpop.xlane.xlu0 %323 }
 0x139   : > { %1839 = vrsqrt.f32 %v403_v46  ;;  %v337_v50 = vmul.f32 0.003921569, %v333_v48  ;;  %v334_v51 = vmul.f32 0.003921569, %v324_v49 }
 0x13a   : > { %1841 = vrsqrt.f32 %v340_v47 }
 0x13b   : > { %v341_v52 = vadd.f32 1e-05, %v337_v50  ;;  %v338_v53 = vadd.f32 1e-05, %v334_v51 }
 0x13c   : > { %v327_v56 = vpop.xlane.xlu1 %326 }
 0x13d   : > { %1843 = vrsqrt.f32 %v341_v52  ;;  %v335_v59 = vmul.f32 0.003921569, %v327_v56 }
 0x13e   : > { %1845 = vrsqrt.f32 %v338_v53  ;;  %v1834_v61 = vpop.eup %1833 }
 0x13f   : > { %v339_v60 = vadd.f32 1e-05, %v335_v59  ;;  %v415_v3 = vmul.f32 %v1834_v61, %v2131_v29  ;;  %v414_v10 = vmul.f32 %v1834_v61, %v2128_v28 }
 0x140   : > { %v2259_v8 = vpop.permute.xlu1 %452  ;;  %v2261_v33 = vpop.permute.xlu0 %447 }
 0x141   : > { %1847 = vrsqrt.f32 %v339_v60 }
 0x142   : > { %v1836_v62 = vpop.eup %1835 }
 0x143   : > { %v1838_v63 = vpop.eup %1837  ;;  %v417_v7 = vmul.f32 %v1836_v62, %v2151_v41  ;;  %v416_v11 = vmul.f32 %v1836_v62, %v2148_v40 }
 0x144   : > { %v411_v23 = vmul.f32 %v1838_v63, %v2137_v32  ;;  %v410_v24 = vmul.f32 %v1838_v63, %v2134_v31  ;;  %v458_v9 = vpop.permute.xlu1 %457 }
 0x145   : > { %v434_v14 = vpack.c.bf16 %v417_v7, %v415_v3  ;;  %v433_v17 = vpack.c.bf16 %v416_v11, %v414_v10 }
 0x146   : > { %v1840_v22 = vpop.eup %1839 }
 0x147   : > { %v1842_v18 = vpop.eup %1841  ;;  %493 = vmatprep.subr.bf16.mxu0 %v434_v14  ;;  %1811 = vmatprep.subr.bf16.mxu1 %v434_v14  ;;  %v413_v19 = vmul.f32 %v1840_v22, %v2157_v44  ;;  %v412_v29 = vmul.f32 %v1840_v22, %v2154_v43 }
 0x148   : > { %494 = vmatpush1.bf16.msra.mxu0 %v433_v17  ;;  %1817 = vmatpush1.bf16.msra.mxu1 %v433_v17  ;;  %v351_v40 = vmul.f32 %v1842_v18, %v2169_v55  ;;  %v350_v25 = vmul.f32 %v1842_v18, %v2167_v54  ;;  %v418_v54 = vld [vmem:[%s2862_s2] sm:$0xff]  ;;  %v463_v45 = vpop.permute.xlu1 %462 }
 0x149   : > { %v432_v41 = vpack.c.bf16 %v413_v19, %v411_v23  ;;  %v431_v28 = vpack.c.bf16 %v412_v29, %v410_v24 }
 0x14a   : > { %v1844_v20 = vpop.eup %1843 }
 0x14b   : > { %v1846_v21 = vpop.eup %1845  ;;  %495 = vmatprep.subr.bf16.mxu0 %v432_v41  ;;  %1812 = vmatprep.subr.bf16.mxu1 %v432_v41  ;;  %v353_v32 = vmul.f32 %v1844_v20, %v2173_v58  ;;  %v352_v44 = vmul.f32 %v1844_v20, %v2171_v57  ;;  %v419_v57 = vld [vmem:[%s2862_s2 + $0x8] sm:$0xff]  ;;  %v420_v58 = vld [vmem:[%s2862_s2 + $0x10] sm:$0xff] }
 0x14c   : > { %496 = vmatpush1.bf16.msra.mxu0 %v431_v28  ;;  %1818 = vmatpush1.bf16.msra.mxu1 %v431_v28  ;;  %v347_v27 = vmul.f32 %v1846_v21, %v2185_v13  ;;  %v346_v0 = vmul.f32 %v1846_v21, %v2183_v12  ;;  %v421_v12 = vld [vmem:[%s2862_s2 + $0x18] sm:$0xff] }
 0x14d   : > { %v430_v31 = vpack.c.bf16 %v353_v32, %v351_v40  ;;  %v429_v43 = vpack.c.bf16 %v352_v44, %v350_v25  ;;  %v425_v2 = vpack.c.bf16 %v421_v12, %v420_v58 }
 0x14e   : > { %v1848_v26 = vpop.eup %1847 }
 0x14f   : > { %497 = vmatprep.subr.bf16.mxu0 %v430_v31  ;;  %1813 = vmatprep.subr.bf16.mxu1 %v430_v31  ;;  %v349_v55 = vmul.f32 %v1848_v26, %v2189_v16  ;;  %v348_v1 = vmul.f32 %v1848_v26, %v2187_v15  ;;  %v424_v16 = vpack.c.bf16 %v419_v57, %v418_v54 }
 0x150   : > { %498 = vmatpush1.bf16.msra.mxu0 %v429_v43  ;;  %1819 = vmatpush1.bf16.msra.mxu1 %v429_v43 }
 0x151   : > { %v428_v13 = vpack.c.bf16 %v349_v55, %v347_v27  ;;  %v427_v15 = vpack.c.bf16 %v348_v1, %v346_v0 }
 0x153   : > { %499 = vmatprep.subr.bf16.mxu0 %v428_v13  ;;  %1814 = vmatprep.subr.bf16.mxu1 %v428_v13 }
 0x154   : > { %500 = vmatpush1.bf16.msra.mxu0 %v427_v15  ;;  %1820 = vmatpush1.bf16.msra.mxu1 %v427_v15 }
 0x157   : > { %1763 = vmatmul.mubr.msk.bf16.vlgmr.msra.gmra.mxu0 %vm475_vm0, %v424_v16  ;;  %1764 = vmatmul.mubr.msk.bf16.vlgmr.msra.gmra.mxu1 %vm475_vm0, %v425_v2 }
 0x158   : > { %537 = vmatprep.mubr.bf16.mxu1 %v2049_v30 }
 0x15f   : > { %1765 = vmatmul.mubr.msk.bf16.gmra.mxu1 %vm475_vm0, %v426_v6 }
 0x160   : > { %723 = vmatprep.mubr.bf16.mxu1 %v2049_v30 }
 0x217   : > { %v519_v34 = vpop.f32.mrf.mxu0  ;;  %v529_v35 = vpop.f32.mrf.mxu1 }
 0x218   : > { %v520_v36 = vadd.f32 %v519_v34, %v2261_v33  ;;  %v530_v39 = vadd.f32 %v529_v35, %v458_v9 }
 0x219   : > { %v2264_v37 = vpop.f32.mrf.mxu0  ;;  %v531_v38 = vpop.f32.mrf.mxu1 }
 0x21a   : > { %v548_v42 = vmax.f32 %v520_v36, 0.0  ;;  %v532_v46 = vadd.f32 %v531_v38, %v458_v9  ;;  %v552_v53 = vmax.f32 %v530_v39, 0.0 }
 0x21b   : > { %v523_v47 = vpop.f32.mrf.mxu0  ;;  %v533_v48 = vpop.f32.mrf.mxu1 }
 0x21c   : > { %v524_v49 = vadd.f32 %v523_v47, %v2259_v8  ;;  %v534_v50 = vadd.f32 %v533_v48, %v463_v45  ;;  %v560_v52 = vmin.f32 %v548_v42, 6.0  ;;  %v553_v59 = vmax.f32 %v532_v46, 0.0 }
 0x21d   : > { %v535_v51 = vpop.f32.mrf.mxu1  ;;  %v564_v3 = vmin.f32 %v552_v53, 6.0 }
 0x21e   : > { %v550_v56 = vmax.f32 %v524_v49, 0.0  ;;  %v554_v60 = vmax.f32 %v534_v50, 0.0  ;;  %v536_v61 = vadd.f32 %v535_v51, %v463_v45  ;;  %576 = vxpose.xlu1.b32.start [1/2] (short) %v560_v52, 128  ;;  %v565_v10 = vmin.f32 %v553_v59, 6.0 }
 0x21f   : > { %v2288_v12 = vpop.f32.mrf.mxu1 }
 0x220   : > { %v562_v62 = vmin.f32 %v550_v56, 6.0  ;;  %v555_v63 = vmax.f32 %v536_v61, 0.0  ;;  %v566_v7 = vmin.f32 %v554_v60, 6.0 }
 0x221   : > { %v2290_v13 = vpop.f32.mrf.mxu1 }
 0x222   : > { %v567_v11 = vmin.f32 %v555_v63, 6.0  ;;  %577 = vxpose.xlu1.b32.end [2/2] (short) %v562_v62, 128  ;;  %v2269_v17 = vpack.c.bf16 %v566_v7, %v564_v3 }
 0x223   : > { %v2292_v15 = vpop.f32.mrf.mxu1 }
 0x224   : > { %v2267_v14 = vpack.c.bf16 %v567_v11, %v565_v10 }
 0x225   : > { %v2294_v16 = vpop.f32.mrf.mxu1 }
 0x226   : > { %705 = vmatprep.subr.bf16.mxu1 %v2267_v14 }
 0x227   : > { %706 = vmatpush1.bf16.msra.mxu1 %v2269_v17 }
 0x29a   : > { %v592_v22 = vpop.trf.xlu1 }
 0x29e   : > { %v593_v23 = vpop.trf.xlu1 }
 0x29f   : > { %v640_v18 = vpack.c.bf16 %v593_v23, %v592_v22 }
 0x2a1   : > { %1766 = vmatmul.mubr.msk.bf16.vlgmr.msra.gmra.mxu1 %vm666_vm1, %v640_v18 }
 0x2a2   : > { %v594_v19 = vpop.trf.xlu1  ;;  %733 = vmatprep.mubr.bf16.mxu1 %v2049_v30 }
 0x2a6   : > { %v595_v24 = vpop.trf.xlu1 }
 0x2a7   : > { %v641_v29 = vpack.c.bf16 %v595_v24, %v594_v19 }
 0x2a9   : > { %1767 = vmatmul.mubr.msk.bf16.gmra.mxu1 %vm666_vm1, %v641_v29 }
 0x2aa   : > { %v596_v41 = vpop.trf.xlu1  ;;  %743 = vmatprep.mubr.bf16.mxu1 %v2049_v30 }
 0x2ae   : > { %v597_v28 = vpop.trf.xlu1 }
 0x2af   : > { %v642_v20 = vpack.c.bf16 %v597_v28, %v596_v41 }
 0x2b1   : > { %1768 = vmatmul.mubr.msk.bf16.gmra.mxu1 %vm666_vm1, %v642_v20 }
 0x2b2   : > { %v598_v40 = vpop.trf.xlu1  ;;  %753 = vmatprep.mubr.bf16.mxu1 %v2049_v30 }
 0x2b6   : > { %v599_v21 = vpop.trf.xlu1 }
 0x2b7   : > { %v643_v32 = vpack.c.bf16 %v599_v21, %v598_v40 }
 0x2b9   : > { %1769 = vmatmul.mubr.msk.bf16.gmra.mxu1 %vm666_vm1, %v643_v32 }
 0x2ba   : > { %v600_v25 = vpop.trf.xlu1  ;;  %763 = vmatprep.mubr.bf16.mxu1 %v2049_v30 }
 0x2be   : > { %v601_v44 = vpop.trf.xlu1 }
 0x2bf   : > { %v644_v31 = vpack.c.bf16 %v601_v44, %v600_v25 }
 0x2c1   : > { %1770 = vmatmul.mubr.msk.bf16.gmra.mxu1 %vm666_vm1, %v644_v31 }
 0x2c2   : > { %v602_v43 = vpop.trf.xlu1  ;;  %773 = vmatprep.mubr.bf16.mxu1 %v2049_v30 }
 0x2c6   : > { %v603_v26 = vpop.trf.xlu1 }
 0x2c7   : > { %v645_v27 = vpack.c.bf16 %v603_v26, %v602_v43 }
 0x2c9   : > { %1771 = vmatmul.mubr.msk.bf16.gmra.mxu1 %vm666_vm1, %v645_v27 }
 0x2ca   : > { %v604_v55 = vpop.trf.xlu1  ;;  %783 = vmatprep.mubr.bf16.mxu1 %v2049_v30 }
 0x2ce   : > { %v605_v0 = vpop.trf.xlu1 }
 0x2cf   : > { %v646_v1 = vpack.c.bf16 %v605_v0, %v604_v55 }
 0x2d1   : > { %1772 = vmatmul.mubr.msk.bf16.gmra.mxu1 %vm666_vm1, %v646_v1 }
 0x2d2   : > { %v606_v54 = vpop.trf.xlu1  ;;  %793 = vmatprep.mubr.bf16.mxu1 %v2049_v30 }
 0x2d6   : > { %v607_v57 = vpop.trf.xlu1 }
 0x2d7   : > { %v647_v58 = vpack.c.bf16 %v607_v57, %v606_v54 }
 0x2d9   : > { %1773 = vmatmul.mubr.msk.bf16.gmra.mxu1 %vm666_vm1, %v647_v58 }
 0x361   : > { %v2296_v2 = vpop.f32.mrf.mxu1 }
 0x363   : > { %v2298_v4 = vpop.f32.mrf.mxu1 }
 0x364   : > { %v804_v26 = vmax.f32 %v2296_v2, %v2298_v4 }
 0x365   : > { %v2300_v5 = vpop.f32.mrf.mxu1 }
 0x367   : > { %v2302_v6 = vpop.f32.mrf.mxu1 }
 0x368   : > { %v807_v27 = vmax.f32 %v2300_v5, %v2302_v6 }
 0x369   : > { %v2304_v9 = vpop.f32.mrf.mxu1 }
 0x36b   : > { %v2306_v34 = vpop.f32.mrf.mxu1 }
 0x36c   : > { %v810_v31 = vmax.f32 %v2304_v9, %v2306_v34 }
 0x36d   : > { %v2308_v35 = vpop.f32.mrf.mxu1 }
 0x36f   : > { %v2310_v36 = vpop.f32.mrf.mxu1 }
 0x370   : > { %v813_v43 = vmax.f32 %v2308_v35, %v2310_v36 }
 0x371   : > { %v2312_v38 = vpop.f32.mrf.mxu1 }
 0x373   : > { %v2314_v39 = vpop.f32.mrf.mxu1 }
 0x374   : > { %v816_v25 = vmax.f32 %v2312_v38, %v2314_v39 }
 0x375   : > { %v2316_v42 = vpop.f32.mrf.mxu1 }
 0x377   : > { %v2318_v45 = vpop.f32.mrf.mxu1 }
 0x378   : > { %v819_v44 = vmax.f32 %v2316_v42, %v2318_v45 }
 0x379   : > { %v2320_v46 = vpop.f32.mrf.mxu1 }
 0x37b   : > { %v2322_v47 = vpop.f32.mrf.mxu1 }
 0x37c   : > { %v822_v21 = vmax.f32 %v2320_v46, %v2322_v47 }
 0x37d   : > { %v2324_v48 = vpop.f32.mrf.mxu1 }
 0x37f   : > { %v2326_v49 = vpop.f32.mrf.mxu1 }
 0x380   : > { %v825_v32 = vmax.f32 %v2324_v48, %v2326_v49 }
 0x381   : > { %v2328_v50 = vpop.f32.mrf.mxu1 }
 0x383   : > { %v2330_v51 = vpop.f32.mrf.mxu1 }
 0x384   : > { %v828_v20 = vmax.f32 %v2328_v50, %v2330_v51 }
 0x385   : > { %v2332_v52 = vpop.f32.mrf.mxu1 }
 0x387   : > { %v2334_v53 = vpop.f32.mrf.mxu1 }
 0x388   : > { %v831_v40 = vmax.f32 %v2332_v52, %v2334_v53 }
 0x389   : > { %v2336_v56 = vpop.f32.mrf.mxu1 }
 0x38b   : > { %v2338_v59 = vpop.f32.mrf.mxu1 }
 0x38c   : > { %v834_v41 = vmax.f32 %v2336_v56, %v2338_v59 }
 0x38d   : > { %v2340_v60 = vpop.f32.mrf.mxu1 }
 0x38f   : > { %v2342_v61 = vpop.f32.mrf.mxu1 }
 0x390   : > { %v837_v28 = vmax.f32 %v2340_v60, %v2342_v61 }
 0x391   : > { %v785_v62 = vpop.f32.mrf.mxu1 }
 0x393   : > { %v787_v63 = vpop.f32.mrf.mxu1 }
 0x394   : > { %v840_v19 = vmax.f32 %v785_v62, %v787_v63 }
 0x395   : > { %v789_v3 = vpop.f32.mrf.mxu1 }
 0x397   : > { %v2344_v7 = vpop.f32.mrf.mxu1 }
 0x398   : > { %v843_v29 = vmax.f32 %v789_v3, %v2344_v7 }
 0x399   : > { %v795_v10 = vpop.f32.mrf.mxu1 }
 0x39b   : > { %v797_v11 = vpop.f32.mrf.mxu1 }
 0x39c   : > { %v846_v22 = vmax.f32 %v795_v10, %v797_v11 }
 0x39d   : > { %v799_v23 = vpop.f32.mrf.mxu1 }
 0x39e   : > { %847 = vmax.xlane.f32.xlu0 %v846_v22 }
 0x39f   : > { %v801_v18 = vpop.f32.mrf.mxu1 }
 0x3a0   : > { %v849_v24 = vmax.f32 %v799_v23, %v801_v18 }
 0x3a2   : > { %841 = vmax.xlane.f32.xlu0 %v840_v19  ;;  %850 = vmax.xlane.f32.xlu1 %v849_v24 }
 0x3a6   : > { %844 = vmax.xlane.f32.xlu0 %v843_v29 }
 0x3aa   : > { %835 = vmax.xlane.f32.xlu0 %v834_v41 }
 0x3ae   : > { %838 = vmax.xlane.f32.xlu0 %v837_v28 }
 0x3b2   : > { %829 = vmax.xlane.f32.xlu0 %v828_v20 }
 0x3b6   : > { %832 = vmax.xlane.f32.xlu0 %v831_v40 }
 0x3ba   : > { %823 = vmax.xlane.f32.xlu0 %v822_v21 }
 0x3be   : > { %826 = vmax.xlane.f32.xlu0 %v825_v32 }
 0x3c2   : > { %817 = vmax.xlane.f32.xlu0 %v816_v25 }
 0x3c6   : > { %820 = vmax.xlane.f32.xlu0 %v819_v44 }
 0x3ca   : > { %811 = vmax.xlane.f32.xlu0 %v810_v31 }
 0x3ce   : > { %814 = vmax.xlane.f32.xlu0 %v813_v43 }
 0x3d2   : > { %805 = vmax.xlane.f32.xlu0 %v804_v26 }
 0x3d6   : > { %808 = vmax.xlane.f32.xlu0 %v807_v27 }
 0x427   : > { %v848_v55 = vpop.xlane.xlu0 %847 }
 0x428   : > { %v880_v0 = vsub.f32 %v795_v10, %v848_v55  ;;  %v881_v1 = vsub.f32 %v797_v11, %v848_v55 }
 0x42a   : > { %v940_v54 = vmul.f32 1.442695, %v880_v0  ;;  %v942_v57 = vmul.f32 1.442695, %v881_v1 }
 0x42b   : > { %v842_v58 = vpop.xlane.xlu0 %841  ;;  %v851_v22 = vpop.xlane.xlu1 %850 }
 0x42c   : > { %1849 = vpow2.f32 %v940_v54  ;;  %v876_v19 = vsub.f32 %v785_v62, %v842_v58  ;;  %v882_v24 = vsub.f32 %v799_v23, %v851_v22  ;;  %v877_v29 = vsub.f32 %v787_v63, %v842_v58 }
 0x42d   : > { %1851 = vpow2.f32 %v942_v57  ;;  %v883_v41 = vsub.f32 %v801_v18, %v851_v22 }
 0x42e   : > { %v944_v28 = vmul.f32 1.442695, %v882_v24  ;;  %v932_v21 = vmul.f32 1.442695, %v876_v19  ;;  %v934_v25 = vmul.f32 1.442695, %v877_v29 }
 0x42f   : > { %v946_v20 = vmul.f32 1.442695, %v883_v41  ;;  %v845_v40 = vpop.xlane.xlu0 %844 }
 0x430   : > { %v878_v32 = vsub.f32 %v789_v3, %v845_v40  ;;  %v879_v44 = vsub.f32 %v2344_v7, %v845_v40  ;;  %1853 = vpow2.f32 %v944_v28 }
 0x431   : > { %1855 = vpow2.f32 %v946_v20 }
 0x432   : > { %1857 = vpow2.f32 %v932_v21  ;;  %v936_v11 = vmul.f32 1.442695, %v878_v32  ;;  %v938_v62 = vmul.f32 1.442695, %v879_v44 }
 0x433   : > { %v836_v10 = vpop.xlane.xlu0 %835  ;;  %1859 = vpow2.f32 %v934_v25 }
 0x434   : > { %v872_v31 = vsub.f32 %v2336_v56, %v836_v10  ;;  %v873_v63 = vsub.f32 %v2338_v59, %v836_v10  ;;  %1861 = vpow2.f32 %v936_v11 }
 0x435   : > { %1863 = vpow2.f32 %v938_v62 }
 0x436   : > { %v924_v18 = vmul.f32 1.442695, %v872_v31  ;;  %v926_v7 = vmul.f32 1.442695, %v873_v63 }
 0x437   : > { %v839_v23 = vpop.xlane.xlu0 %838 }
 0x438   : > { %v874_v43 = vsub.f32 %v2340_v60, %v839_v23  ;;  %v875_v26 = vsub.f32 %v2342_v61, %v839_v23  ;;  %1865 = vpow2.f32 %v924_v18 }
 0x439   : > { %v2375_v3 = vpop.eup %1849  ;;  %1867 = vpow2.f32 %v926_v7 }
 0x43a   : > { %v2378_v27 = vpop.eup %1851  ;;  %v928_v0 = vmul.f32 1.442695, %v874_v43  ;;  %v930_v1 = vmul.f32 1.442695, %v875_v26 }
 0x43b   : > { %v830_v55 = vpop.xlane.xlu0 %829  ;;  %v990_v56 = vadd.f32 %v2378_v27, %v2375_v3 }
 0x43c   : > { %v868_v59 = vsub.f32 %v2328_v50, %v830_v55  ;;  %v869_v60 = vsub.f32 %v2330_v51, %v830_v55  ;;  %1869 = vpow2.f32 %v928_v0 }
 0x43d   : > { %991 = vadd.xlane.f32.xlu0 %v990_v56  ;;  %v2384_v54 = vpop.eup %1853  ;;  %1871 = vpow2.f32 %v930_v1 }
 0x43e   : > { %v2386_v58 = vpop.eup %1855  ;;  %v916_v61 = vmul.f32 1.442695, %v868_v59  ;;  %v918_v24 = vmul.f32 1.442695, %v869_v60 }
 0x43f   : > { %v833_v57 = vpop.xlane.xlu0 %832  ;;  %v2389_v19 = vpop.eup %1857  ;;  %v993_v29 = vadd.f32 %v2386_v58, %v2384_v54 }
 0x440   : > { %v870_v22 = vsub.f32 %v2332_v52, %v833_v57  ;;  %v871_v50 = vsub.f32 %v2334_v53, %v833_v57  ;;  %v2394_v51 = vpop.eup %1859  ;;  %1873 = vpow2.f32 %v916_v61 }
 0x441   : > { %994 = vadd.xlane.f32.xlu0 %v993_v29  ;;  %v2398_v52 = vpop.eup %1861  ;;  %1875 = vpow2.f32 %v918_v24  ;;  %v984_v53 = vadd.f32 %v2394_v51, %v2389_v19 }
 0x442   : > { %v920_v28 = vmul.f32 1.442695, %v870_v22  ;;  %v922_v21 = vmul.f32 1.442695, %v871_v50  ;;  %v2402_v32 = vpop.eup %1863 }
 0x443   : > { %v824_v41 = vpop.xlane.xlu0 %823 }
 0x444   : > { %v864_v20 = vsub.f32 %v2320_v46, %v824_v41  ;;  %v865_v40 = vsub.f32 %v2322_v47, %v824_v41  ;;  %1877 = vpow2.f32 %v920_v28  ;;  %v987_v47 = vadd.f32 %v2402_v32, %v2398_v52 }
 0x445   : > { %985 = vadd.xlane.f32.xlu0 %v984_v53  ;;  %v2406_v31 = vpop.eup %1865  ;;  %1879 = vpow2.f32 %v922_v21 }
 0x446   : > { %v908_v25 = vmul.f32 1.442695, %v864_v20  ;;  %v910_v44 = vmul.f32 1.442695, %v865_v40  ;;  %v2410_v62 = vpop.eup %1867 }
 0x447   : > { %v827_v10 = vpop.xlane.xlu0 %826  ;;  %v978_v7 = vadd.f32 %v2410_v62, %v2406_v31 }
 0x448   : > { %v866_v11 = vsub.f32 %v2324_v48, %v827_v10  ;;  %v867_v46 = vsub.f32 %v2326_v49, %v827_v10  ;;  %1881 = vpow2.f32 %v908_v25 }
 0x449   : > { %1883 = vpow2.f32 %v910_v44  ;;  %988 = vadd.xlane.f32.xlu0 %v987_v47  ;;  %v2414_v49 = vpop.eup %1869 }
 0x44a   : > { %v912_v63 = vmul.f32 1.442695, %v866_v11  ;;  %v914_v23 = vmul.f32 1.442695, %v867_v46  ;;  %v2418_v26 = vpop.eup %1871 }
 0x44b   : > { %v818_v18 = vpop.xlane.xlu0 %817 }
 0x44c   : > { %1885 = vpow2.f32 %v912_v63  ;;  %v860_v43 = vsub.f32 %v2312_v38, %v818_v18  ;;  %v861_v48 = vsub.f32 %v2314_v39, %v818_v18  ;;  %v981_v39 = vadd.f32 %v2418_v26, %v2414_v49 }
 0x44d   : > { %1887 = vpow2.f32 %v914_v23  ;;  %979 = vadd.xlane.f32.xlu0 %v978_v7  ;;  %v2422_v38 = vpop.eup %1873 }
 0x44e   : > { %v900_v55 = vmul.f32 1.442695, %v860_v43  ;;  %v902_v56 = vmul.f32 1.442695, %v861_v48  ;;  %v2426_v60 = vpop.eup %1875 }
 0x44f   : > { %v821_v0 = vpop.xlane.xlu0 %820 }
 0x450   : > { %1889 = vpow2.f32 %v900_v55  ;;  %v862_v59 = vsub.f32 %v2316_v42, %v821_v0  ;;  %v863_v1 = vsub.f32 %v2318_v45, %v821_v0  ;;  %v972_v45 = vadd.f32 %v2426_v60, %v2422_v38 }
 0x451   : > { %1891 = vpow2.f32 %v902_v56  ;;  %982 = vadd.xlane.f32.xlu0 %v981_v39  ;;  %v2430_v42 = vpop.eup %1877 }
 0x452   : > { %v904_v57 = vmul.f32 1.442695, %v862_v59  ;;  %v906_v61 = vmul.f32 1.442695, %v863_v1  ;;  %v2434_v29 = vpop.eup %1879 }
 0x453   : > { %v812_v22 = vpop.xlane.xlu0 %811  ;;  %v975_v25 = vadd.f32 %v2434_v29, %v2430_v42 }
 0x454   : > { %1893 = vpow2.f32 %v904_v57  ;;  %v856_v24 = vsub.f32 %v2304_v9, %v812_v22  ;;  %v857_v50 = vsub.f32 %v2306_v34, %v812_v22 }
 0x455   : > { %1895 = vpow2.f32 %v906_v61  ;;  %v2436_v20 = vpop.eup %1881  ;;  %973 = vadd.xlane.f32.xlu0 %v972_v45 }
 0x456   : > { %v892_v41 = vmul.f32 1.442695, %v856_v24  ;;  %v894_v28 = vmul.f32 1.442695, %v857_v50  ;;  %v2438_v21 = vpop.eup %1883 }
 0x457   : > { %v815_v40 = vpop.xlane.xlu0 %814  ;;  %v966_v23 = vadd.f32 %v2438_v21, %v2436_v20 }
 0x458   : > { %1897 = vpow2.f32 %v892_v41  ;;  %v858_v9 = vsub.f32 %v2308_v35, %v815_v40  ;;  %v859_v34 = vsub.f32 %v2310_v36, %v815_v40 }
 0x459   : > { %v2442_v53 = vpop.eup %1885  ;;  %1899 = vpow2.f32 %v894_v28  ;;  %976 = vadd.xlane.f32.xlu0 %v975_v25  ;;  %v443_v25 = vld [vmem:[%s2863_s3 + $0x20] sm:$0xff] }
 0x45a   : > { %v2446_v44 = vpop.eup %1887  ;;  %v896_v10 = vmul.f32 1.442695, %v858_v9  ;;  %v898_v11 = vmul.f32 1.442695, %v859_v34  ;;  %v444_v34 = vld [vmem:[%s2863_s3 + $0x28] sm:$0xff] }
 0x45b   : > { %v806_v46 = vpop.xlane.xlu0 %805  ;;  %v969_v47 = vadd.f32 %v2446_v44, %v2442_v53 }
 0x45c   : > { %1901 = vpow2.f32 %v896_v10  ;;  %v852_v35 = vsub.f32 %v2296_v2, %v806_v46  ;;  %v853_v36 = vsub.f32 %v2298_v4, %v806_v46  ;;  %v522_v10 = vadd.f32 %v2264_v37, %v2261_v33 }
 0x45d   : > { %v2452_v63 = vpop.eup %1889  ;;  %1903 = vpow2.f32 %v898_v11  ;;  %970 = vadd.xlane.f32.xlu1 %v969_v47  ;;  %967 = vadd.xlane.f32.xlu0 %v966_v23  ;;  %v525_v11 = vpop.f32.mrf.mxu0 }
 0x45e   : > { %v2456_v18 = vpop.eup %1891  ;;  %v884_v43 = vmul.f32 1.442695, %v852_v35  ;;  %v886_v48 = vmul.f32 1.442695, %v853_v36  ;;  %v549_v46 = vmax.f32 %v522_v10, 0.0  ;;  %v526_v47 = vadd.f32 %v525_v11, %v2259_v8 }
 0x45f   : > { %v809_v7 = vpop.xlane.xlu0 %808  ;;  %v960_v55 = vadd.f32 %v2456_v18, %v2452_v63 }
 0x460   : > { %1905 = vpow2.f32 %v884_v43  ;;  %v854_v2 = vsub.f32 %v2300_v5, %v809_v7  ;;  %v855_v4 = vsub.f32 %v2302_v6, %v809_v7  ;;  %v561_v35 = vmin.f32 %v549_v46, 6.0 }
 0x461   : > { %v2462_v56 = vpop.eup %1893  ;;  %1907 = vpow2.f32 %v886_v48  ;;  %961 = vadd.xlane.f32.xlu0 %v960_v55  ;;  %v551_v36 = vmax.f32 %v526_v47, 0.0 }
 0x462   : > { %v2464_v0 = vpop.eup %1895  ;;  %v888_v59 = vmul.f32 1.442695, %v854_v2  ;;  %v890_v1 = vmul.f32 1.442695, %v855_v4 }
 0x463   : > { %v963_v39 = vadd.f32 %v2464_v0, %v2462_v56  ;;  %v563_v23 = vmin.f32 %v551_v36, 6.0 }
 0x464   : > { %1909 = vpow2.f32 %v888_v59 }
 0x465   : > { %v2468_v57 = vpop.eup %1897  ;;  %1911 = vpow2.f32 %v890_v1  ;;  %964 = vadd.xlane.f32.xlu1 %v963_v39 }
 0x466   : > { %v2470_v61 = vpop.eup %1899 }
 0x467   : > { %v954_v5 = vadd.f32 %v2470_v61, %v2468_v57 }
 0x469   : > { %v2474_v6 = vpop.eup %1901  ;;  %955 = vadd.xlane.f32.xlu0 %v954_v5 }
 0x46a   : > { %v2476_v22 = vpop.eup %1903 }
 0x46b   : > { %v957_v24 = vadd.f32 %v2476_v22, %v2474_v6 }
 0x46d   : > { %v2480_v50 = vpop.eup %1905  ;;  %958 = vadd.xlane.f32.xlu1 %v957_v24 }
 0x46e   : > { %v2482_v45 = vpop.eup %1907 }
 0x46f   : > { %v948_v41 = vadd.f32 %v2482_v45, %v2480_v50 }
 0x471   : > { %v2486_v28 = vpop.eup %1909  ;;  %949 = vadd.xlane.f32.xlu0 %v948_v41 }
 0x472   : > { %v2488_v40 = vpop.eup %1911 }
 0x473   : > { %v951_v9 = vadd.f32 %v2488_v40, %v2486_v28 }
 0x475   : > { %952 = vadd.xlane.f32.xlu1 %v951_v9 }
 0x486   : > { %472 = vperm.xlu1 %1832, %v444_v34  }
 0x487   : > { %467 = vperm.xlu0 %1831, %v443_v25  }
 0x4af   : > { %608 = vxpose.xlu1.b32.start [1/2] (short) %v561_v35, 128 }
 0x4b3   : > { %609 = vxpose.xlu1.b32.end [2/2] (short) %v563_v23, 128 }
 0x4c6   : > { %v992_v43 = vpop.xlane.xlu0 %991 }
 0x4c7   : > { %1913 = vrcp.f32 %v992_v43 }
 0x4ca   : > { %v995_v48 = vpop.xlane.xlu0 %994 }
 0x4cb   : > { %1915 = vrcp.f32 %v995_v48 }
 0x4ce   : > { %v986_v7 = vpop.xlane.xlu0 %985 }
 0x4cf   : > { %1917 = vrcp.f32 %v986_v7 }
 0x4d2   : > { %v989_v55 = vpop.xlane.xlu0 %988 }
 0x4d3   : > { %1919 = vrcp.f32 %v989_v55 }
 0x4d4   : > { %v1914_v2 = vpop.eup %1913 }
 0x4d5   : > { %v1041_v37 = vmul.f32 %v1914_v2, %v2378_v27  ;;  %v1040_v59 = vmul.f32 %v1914_v2, %v2375_v3 }
 0x4d6   : > { %v980_v4 = vpop.xlane.xlu0 %979 }
 0x4d7   : > { %1921 = vrcp.f32 %v980_v4 }
 0x4d8   : > { %v1916_v33 = vpop.eup %1915 }
 0x4d9   : > { %v1043_v8 = vmul.f32 %v1916_v33, %v2386_v58  ;;  %v1042_v1 = vmul.f32 %v1916_v33, %v2384_v54 }
 0x4da   : > { %v983_v39 = vpop.xlane.xlu0 %982 }
 0x4db   : > { %1923 = vrcp.f32 %v983_v39  ;;  %v1059_v5 = vpack.c.bf16 %v1043_v8, %v1041_v37  ;;  %v1058_v24 = vpack.c.bf16 %v1042_v1, %v1040_v59 }
 0x4dc   : > { %v1918_v41 = vpop.eup %1917 }
 0x4dd   : > { %1060 = vmatprep.subr.bf16.mxu1 %v1059_v5  ;;  %v1037_v25 = vmul.f32 %v1918_v41, %v2394_v51  ;;  %v1036_v58 = vmul.f32 %v1918_v41, %v2389_v19 }
 0x4de   : > { %1061 = vmatpush1.bf16.xpose.msra.mxu1 %v1058_v24  ;;  %v974_v9 = vpop.xlane.xlu0 %973 }
 0x4df   : > { %1925 = vrcp.f32 %v974_v9 }
 0x4e0   : > { %v1920_v34 = vpop.eup %1919 }
 0x4e1   : > { %v1039_v27 = vmul.f32 %v1920_v34, %v2402_v32  ;;  %v1038_v3 = vmul.f32 %v1920_v34, %v2398_v52 }
 0x4e2   : > { %v977_v10 = vpop.xlane.xlu0 %976 }
 0x4e3   : > { %1927 = vrcp.f32 %v977_v10  ;;  %v1057_v54 = vpack.c.bf16 %v1039_v27, %v1037_v25  ;;  %v1056_v11 = vpack.c.bf16 %v1038_v3, %v1036_v58 }
 0x4e4   : > { %v1922_v47 = vpop.eup %1921 }
 0x4e5   : > { %1062 = vmatprep.subr.bf16.mxu1 %v1057_v54  ;;  %v1033_v51 = vmul.f32 %v1922_v47, %v2410_v62  ;;  %v1032_v19 = vmul.f32 %v1922_v47, %v2406_v31 }
 0x4e6   : > { %v971_v46 = vpop.xlane.xlu1 %970  ;;  %1063 = vmatpush1.bf16.xpose.msra.mxu1 %v1056_v11  ;;  %v968_v35 = vpop.xlane.xlu0 %967 }
 0x4e7   : > { %1929 = vrcp.f32 %v971_v46 }
 0x4e8   : > { %1931 = vrcp.f32 %v968_v35  ;;  %v1924_v36 = vpop.eup %1923 }
 0x4e9   : > { %v1035_v32 = vmul.f32 %v1924_v36, %v2418_v26  ;;  %v1034_v52 = vmul.f32 %v1924_v36, %v2414_v49 }
 0x4ea   : > { %v962_v23 = vpop.xlane.xlu0 %961 }
 0x4eb   : > { %1933 = vrcp.f32 %v962_v23  ;;  %v1055_v43 = vpack.c.bf16 %v1035_v32, %v1033_v51  ;;  %v1054_v48 = vpack.c.bf16 %v1034_v52, %v1032_v19 }
 0x4ec   : > { %v1926_v55 = vpop.eup %1925 }
 0x4ed   : > { %1064 = vmatprep.subr.bf16.mxu1 %v1055_v43  ;;  %v1029_v33 = vmul.f32 %v1926_v55, %v2426_v60  ;;  %v1028_v26 = vmul.f32 %v1926_v55, %v2422_v38 }
 0x4ee   : > { %v965_v7 = vpop.xlane.xlu1 %964  ;;  %1065 = vmatpush1.bf16.xpose.msra.mxu1 %v1054_v48 }
 0x4ef   : > { %1935 = vrcp.f32 %v965_v7 }
 0x4f0   : > { %v1928_v2 = vpop.eup %1927 }
 0x4f1   : > { %v1031_v62 = vmul.f32 %v1928_v2, %v2434_v29  ;;  %v1030_v31 = vmul.f32 %v1928_v2, %v2430_v42 }
 0x4f2   : > { %v956_v4 = vpop.xlane.xlu0 %955 }
 0x4f3   : > { %v1053_v37 = vpack.c.bf16 %v1031_v62, %v1029_v33  ;;  %v1052_v8 = vpack.c.bf16 %v1030_v31, %v1028_v26  ;;  %1937 = vrcp.f32 %v956_v4 }
 0x4f4   : > { %v1930_v49 = vpop.eup %1929 }
 0x4f5   : > { %v1027_v59 = vmul.f32 %v1930_v49, %v2446_v44  ;;  %v1932_v1 = vpop.eup %1931  ;;  %1066 = vmatprep.subr.bf16.mxu1 %v1053_v37  ;;  %v1026_v42 = vmul.f32 %v1930_v49, %v2442_v53 }
 0x4f6   : > { %v959_v39 = vpop.xlane.xlu1 %958  ;;  %v1025_v5 = vmul.f32 %v1932_v1, %v2438_v21  ;;  %1067 = vmatpush1.bf16.xpose.msra.mxu1 %v1052_v8  ;;  %v1024_v38 = vmul.f32 %v1932_v1, %v2436_v20  ;;  %v658_v8 = vld [vmem:[%s2864_s4 + $0x10] sm:$0xff] }
 0x4f7   : > { %1939 = vrcp.f32 %v959_v39 }
 0x4f8   : > { %v1051_v60 = vpack.c.bf16 %v1027_v59, %v1025_v5  ;;  %v1934_v24 = vpop.eup %1933  ;;  %v1050_v34 = vpack.c.bf16 %v1026_v42, %v1024_v38  ;;  %v659_v59 = vld [vmem:[%s2864_s4 + $0x18] sm:$0xff] }
 0x4f9   : > { %v1021_v44 = vmul.f32 %v1934_v24, %v2456_v18  ;;  %v1020_v18 = vmul.f32 %v1934_v24, %v2452_v63 }
 0x4fa   : > { %v950_v29 = vpop.xlane.xlu0 %949  ;;  %1068 = vmatprep.subr.bf16.mxu1 %v1051_v60  ;;  %v2557_v60 = vpack.c.bf16 %v659_v59, %v658_v8 }
 0x4fb   : > { %1941 = vrcp.f32 %v950_v29 }
 0x4fc   : > { %v1936_v41 = vpop.eup %1935 }
 0x4fd   : > { %v1023_v9 = vmul.f32 %v1936_v41, %v2464_v0  ;;  %v1022_v3 = vmul.f32 %v1936_v41, %v2462_v56 }
 0x4fe   : > { %v953_v25 = vpop.xlane.xlu1 %952  ;;  %1069 = vmatpush1.bf16.xpose.msra.mxu1 %v1050_v34 }
 0x4ff   : > { %1943 = vrcp.f32 %v953_v25  ;;  %v1049_v27 = vpack.c.bf16 %v1023_v9, %v1021_v44  ;;  %v1048_v46 = vpack.c.bf16 %v1022_v3, %v1020_v18 }
 0x500   : > { %v1938_v20 = vpop.eup %1937 }
 0x501   : > { %1070 = vmatprep.subr.bf16.mxu1 %v1049_v27  ;;  %v1017_v47 = vmul.f32 %v1938_v20, %v2470_v61  ;;  %v1016_v63 = vmul.f32 %v1938_v20, %v2468_v57 }
 0x502   : > { %v468_v21 = vpop.permute.xlu0 %467  ;;  %v473_v58 = vpop.permute.xlu1 %472 }
 0x503   : > { %v542_v53 = vadd.f32 %v2290_v13, %v468_v21  ;;  %v546_v10 = vadd.f32 %v2294_v16, %v473_v58  ;;  %v540_v43 = vadd.f32 %v2288_v12, %v468_v21  ;;  %v544_v48 = vadd.f32 %v2292_v15, %v473_v58  ;;  %v656_v12 = vld [vmem:[%s2864_s4] sm:$0xff]  ;;  %v657_v15 = vld [vmem:[%s2864_s4 + $0x8] sm:$0xff] }
 0x504   : > { %v1940_v54 = vpop.eup %1939 }
 0x505   : > { %v557_v11 = vmax.f32 %v542_v53, 0.0  ;;  %v559_v0 = vmax.f32 %v546_v10, 0.0  ;;  %v1019_v35 = vmul.f32 %v1940_v54, %v2476_v22  ;;  %v1018_v13 = vmul.f32 %v1940_v54, %v2474_v6 }
 0x506   : > { %1071 = vmatpush1.bf16.xpose.msra.mxu1 %v1048_v46  ;;  %v556_v55 = vmax.f32 %v540_v43, 0.0  ;;  %v558_v2 = vmax.f32 %v544_v48, 0.0 }
 0x507   : > { %v569_v36 = vmin.f32 %v557_v11, 6.0  ;;  %v571_v51 = vmin.f32 %v559_v0, 6.0  ;;  %v1047_v32 = vpack.c.bf16 %v1019_v35, %v1017_v47  ;;  %v1046_v22 = vpack.c.bf16 %v1018_v13, %v1016_v63 }
 0x508   : > { %v1942_v19 = vpop.eup %1941  ;;  %v568_v57 = vmin.f32 %v556_v55, 6.0 }
 0x509   : > { %v2529_v56 = vpack.c.bf16 %v571_v51, %v569_v36  ;;  %1072 = vmatprep.subr.bf16.mxu1 %v1047_v32  ;;  %v1013_v52 = vmul.f32 %v1942_v19, %v2482_v45  ;;  %v1012_v6 = vmul.f32 %v1942_v19, %v2480_v50  ;;  %v570_v45 = vmin.f32 %v558_v2, 6.0 }
 0x50b   : > { %1092 = vmatprep.mubr.bf16.mxu1 %v2529_v56  ;;  %v2540_v33 = vpack.c.bf16 %v570_v45, %v568_v57 }
 0x50c   : > { %v1944_v16 = vpop.eup %1943 }
 0x50d   : > { %v1015_v61 = vmul.f32 %v1944_v16, %v2488_v40  ;;  %v1014_v7 = vmul.f32 %v1944_v16, %v2486_v28  ;;  %v660_v28 = vpack.c.bf16 %v657_v15, %v656_v12 }
 0x50e   : > { %1073 = vmatpush1.bf16.xpose.msra.mxu1 %v1046_v22 }
 0x50f   : > { %v1045_v23 = vpack.c.bf16 %v1015_v61, %v1013_v52  ;;  %v1044_v4 = vpack.c.bf16 %v1014_v7, %v1012_v6  ;;  %1799 = vmatprep.mubr.msk.bf16.mxu0 %vm666_vm1, %v660_v28 }
 0x511   : > { %1074 = vmatprep.subr.bf16.mxu1 %v1045_v23 }
 0x516   : > { %1075 = vmatpush1.bf16.xpose.msra.mxu1 %v1044_v4 }
 0x51d   : > { %1093 = vmatmul.mubr.bf16.vlgmr.msra.gmra.mxu1 %v2540_v33 }
 0x51e   : > { %1805 = vmatprep.mubr.msk.bf16.mxu1 %vm666_vm1, %v660_v28 }
 0x52b   : > { %v624_v50 = vpop.trf.xlu1 }
 0x52f   : > { %v625_v40 = vpop.trf.xlu1 }
 0x530   : > { %v648_v38 = vpack.c.bf16 %v625_v40, %v624_v50 }
 0x533   : > { %v626_v62 = vpop.trf.xlu1 }
 0x537   : > { %v627_v26 = vpop.trf.xlu1 }
 0x538   : > { %v649_v41 = vpack.c.bf16 %v627_v26, %v626_v62 }
 0x53b   : > { %v628_v1 = vpop.trf.xlu1 }
 0x53f   : > { %v629_v24 = vpop.trf.xlu1 }
 0x540   : > { %v650_v44 = vpack.c.bf16 %v629_v24, %v628_v1 }
 0x543   : > { %v630_v29 = vpop.trf.xlu1 }
 0x547   : > { %v631_v42 = vpop.trf.xlu1 }
 0x548   : > { %v651_v34 = vpack.c.bf16 %v631_v42, %v630_v29 }
 0x5dd   : > { %v1094_v31 = vpop.f32.mrf.mxu1 }
 0x5df   : > { %v1096_v49 = vpop.f32.mrf.mxu1 }
 0x5e1   : > { %v1097_v37 = vpop.f32.mrf.mxu1 }
 0x5e2   : > { %v1101_v39 = vpack.c.bf16 %v1097_v37, %v1094_v31 }
 0x5e3   : > { %v1099_v5 = vpop.f32.mrf.mxu1 }
 0x5e4   : > { %1797 = vmatprep.subr.bf16.mxu0 %v1101_v39 }
 0x5e5   : > { %1798 = vmatpush3.bf16.msra.mxu0 %v1101_v39 }
 0x5e6   : > { %1227 = vmatprep.subr.bf16.mxu0 %v2267_v14  ;;  %v632_v14 = vpop.trf.xlu1 }
 0x5e8   : > { %1800 = vmatmul.mubr.msk.bf16.vlgmr.msra.gmra.mxu0 %vm666_vm1, %v2557_v60 }
 0x5e9   : > { %1228 = vmatpush1.bf16.msra.mxu0 %v2269_v17  ;;  %1245 = vmatprep.mubr.bf16.mxu0 %v2049_v30 }
 0x5ea   : > { %v633_v9 = vpop.trf.xlu1 }
 0x5eb   : > { %v652_v27 = vpack.c.bf16 %v633_v9, %v632_v14 }
 0x5ee   : > { %v634_v17 = vpop.trf.xlu1 }
 0x5f0   : > { %1776 = vmatmul.mubr.msk.bf16.vlgmr.msra.gmra.mxu0 %vm666_vm1, %v648_v38 }
 0x5f1   : > { %1255 = vmatprep.mubr.bf16.mxu0 %v2049_v30 }
 0x5f2   : > { %v635_v25 = vpop.trf.xlu1 }
 0x5f3   : > { %v653_v58 = vpack.c.bf16 %v635_v25, %v634_v17 }
 0x5f6   : > { %v636_v21 = vpop.trf.xlu1 }
 0x5f8   : > { %1777 = vmatmul.mubr.msk.bf16.gmra.mxu0 %vm666_vm1, %v649_v41 }
 0x5f9   : > { %1265 = vmatprep.mubr.bf16.mxu0 %v2049_v30 }
 0x5fa   : > { %v637_v3 = vpop.trf.xlu1 }
 0x5fb   : > { %v654_v53 = vpack.c.bf16 %v637_v3, %v636_v21 }
 0x5fe   : > { %v638_v20 = vpop.trf.xlu1 }
 0x600   : > { %1778 = vmatmul.mubr.msk.bf16.gmra.mxu0 %vm666_vm1, %v650_v44 }
 0x601   : > { %1275 = vmatprep.mubr.bf16.mxu0 %v2049_v30 }
 0x602   : > { %v639_v10 = vpop.trf.xlu1 }
 0x603   : > { %v655_v54 = vpack.c.bf16 %v639_v10, %v638_v20 }
 0x608   : > { %1779 = vmatmul.mubr.msk.bf16.gmra.mxu0 %vm666_vm1, %v651_v34 }
 0x609   : > { %1285 = vmatprep.mubr.bf16.mxu0 %v2049_v30 }
 0x610   : > { %1780 = vmatmul.mubr.msk.bf16.gmra.mxu0 %vm666_vm1, %v652_v27 }
 0x611   : > { %1295 = vmatprep.mubr.bf16.mxu0 %v2049_v30 }
 0x618   : > { %1781 = vmatmul.mubr.msk.bf16.gmra.mxu0 %vm666_vm1, %v653_v58 }
 0x619   : > { %1305 = vmatprep.mubr.bf16.mxu0 %v2049_v30 }
 0x620   : > { %1782 = vmatmul.mubr.msk.bf16.gmra.mxu0 %vm666_vm1, %v654_v53 }
 0x621   : > { %1315 = vmatprep.mubr.bf16.mxu0 %v2049_v30 }
 0x628   : > { %1783 = vmatmul.mubr.msk.bf16.gmra.mxu0 %vm666_vm1, %v655_v54 }
 0x629   : > { %1614 = vmatprep.mubr.bf16.mxu0 %v2529_v56 }
 0x6a8   : > { %v2580_v18 = vpop.f32.mrf.mxu0 }
 0x6aa   : > { %v2582_v11 = vpop.f32.mrf.mxu0 }
 0x6ac   : > { %v2584_v0 = vpop.f32.mrf.mxu0 }
 0x6ae   : > { %v2586_v46 = vpop.f32.mrf.mxu0 }
 0x6b0   : > { %v2588_v47 = vpop.f32.mrf.mxu0 }
 0x6b2   : > { %v2590_v35 = vpop.f32.mrf.mxu0 }
 0x6b3   : > { %v1326_v9 = vmax.f32 %v2588_v47, %v2590_v35 }
 0x6b4   : > { %v2592_v36 = vpop.f32.mrf.mxu0 }
 0x6b6   : > { %v2594_v30 = vpop.f32.mrf.mxu0 }
 0x6b7   : > { %v1329_v17 = vmax.f32 %v2592_v36, %v2594_v30 }
 0x6b8   : > { %v2596_v51 = vpop.f32.mrf.mxu0 }
 0x6ba   : > { %v2598_v32 = vpop.f32.mrf.mxu0 }
 0x6bb   : > { %v1332_v14 = vmax.f32 %v2596_v51, %v2598_v32 }
 0x6bc   : > { %v2600_v56 = vpop.f32.mrf.mxu0 }
 0x6be   : > { %v2602_v19 = vpop.f32.mrf.mxu0 }
 0x6bf   : > { %v1335_v44 = vmax.f32 %v2600_v56, %v2602_v19 }
 0x6c0   : > { %v2604_v13 = vpop.f32.mrf.mxu0 }
 0x6c2   : > { %v2606_v16 = vpop.f32.mrf.mxu0 }
 0x6c3   : > { %v1338_v42 = vmax.f32 %v2604_v13, %v2606_v16 }
 0x6c4   : > { %v2608_v63 = vpop.f32.mrf.mxu0 }
 0x6c6   : > { %v2610_v52 = vpop.f32.mrf.mxu0 }
 0x6c7   : > { %v1341_v41 = vmax.f32 %v2608_v63, %v2610_v52 }
 0x6c8   : > { %v2612_v61 = vpop.f32.mrf.mxu0 }
 0x6ca   : > { %v2614_v22 = vpop.f32.mrf.mxu0 }
 0x6cb   : > { %v1344_v29 = vmax.f32 %v2612_v61, %v2614_v22 }
 0x6cc   : > { %v2616_v23 = vpop.f32.mrf.mxu0 }
 0x6ce   : > { %v2618_v43 = vpop.f32.mrf.mxu0 }
 0x6cf   : > { %v1347_v38 = vmax.f32 %v2616_v23, %v2618_v43 }
 0x6d0   : > { %v2620_v48 = vpop.f32.mrf.mxu0 }
 0x6d2   : > { %v2622_v7 = vpop.f32.mrf.mxu0 }
 0x6d3   : > { %v1350_v5 = vmax.f32 %v2620_v48, %v2622_v7 }
 0x6d4   : > { %v2624_v6 = vpop.f32.mrf.mxu0 }
 0x6d6   : > { %v2626_v55 = vpop.f32.mrf.mxu0 }
 0x6d7   : > { %v1353_v24 = vmax.f32 %v2624_v6, %v2626_v55 }
 0x6d8   : > { %v2628_v2 = vpop.f32.mrf.mxu0 }
 0x6da   : > { %v2630_v4 = vpop.f32.mrf.mxu0 }
 0x6db   : > { %v1356_v57 = vmax.f32 %v2628_v2, %v2630_v4 }
 0x6dc   : > { %v2634_v45 = vpop.f32.mrf.mxu0 }
 0x6dd   : > { %1357 = vmax.xlane.f32.xlu1 %v1356_v57 }
 0x6de   : > { %v2636_v12 = vpop.f32.mrf.mxu0 }
 0x6df   : > { %v1359_v39 = vmax.f32 %v2634_v45, %v2636_v12 }
 0x6e0   : > { %v1307_v15 = vpop.f32.mrf.mxu0 }
 0x6e2   : > { %v1309_v28 = vpop.f32.mrf.mxu0 }
 0x6e3   : > { %v1362_v59 = vmax.f32 %v1307_v15, %v1309_v28 }
 0x6e4   : > { %v2638_v50 = vpop.f32.mrf.mxu0 }
 0x6e6   : > { %v2640_v40 = vpop.f32.mrf.mxu0 }
 0x6e7   : > { %v1365_v1 = vmax.f32 %v2638_v50, %v2640_v40 }
 0x6e8   : > { %v1317_v62 = vpop.f32.mrf.mxu0 }
 0x6ea   : > { %v1319_v26 = vpop.f32.mrf.mxu0 }
 0x6eb   : > { %v1368_v31 = vmax.f32 %v1317_v62, %v1319_v26 }
 0x6ec   : > { %v1321_v49 = vpop.f32.mrf.mxu0 }
 0x6ed   : > { %1369 = vmax.xlane.f32.xlu0 %v1368_v31 }
 0x6ee   : > { %v1323_v37 = vpop.f32.mrf.mxu0 }
 0x6ef   : > { %v1371_v8 = vmax.f32 %v1321_v49, %v1323_v37 }
 0x6f1   : > { %1372 = vmax.xlane.f32.xlu0 %v1371_v8 }
 0x6f5   : > { %1363 = vmax.xlane.f32.xlu0 %v1362_v59 }
 0x6f9   : > { %1366 = vmax.xlane.f32.xlu0 %v1365_v1 }
 0x6fd   : > { %1360 = vmax.xlane.f32.xlu0 %v1359_v39 }
 0x701   : > { %1351 = vmax.xlane.f32.xlu0 %v1350_v5 }
 0x705   : > { %1354 = vmax.xlane.f32.xlu0 %v1353_v24 }
 0x709   : > { %1345 = vmax.xlane.f32.xlu0 %v1344_v29 }
 0x70d   : > { %1348 = vmax.xlane.f32.xlu0 %v1347_v38 }
 0x711   : > { %1339 = vmax.xlane.f32.xlu0 %v1338_v42 }
 0x715   : > { %1342 = vmax.xlane.f32.xlu0 %v1341_v41 }
 0x719   : > { %1333 = vmax.xlane.f32.xlu0 %v1332_v14 }
 0x71d   : > { %1336 = vmax.xlane.f32.xlu0 %v1335_v44 }
 0x721   : > { %1327 = vmax.xlane.f32.xlu0 %v1326_v9 }
 0x725   : > { %1330 = vmax.xlane.f32.xlu0 %v1329_v17 }
 0x766   : > { %v1358_v57 = vpop.xlane.xlu1 %1357 }
 0x767   : > { %v1394_v1 = vsub.f32 %v2628_v2, %v1358_v57 }
 0x769   : > { %v1446_v24 = vmul.f32 1.442695, %v1394_v1 }
 0x776   : > { %v1370_v34 = vpop.xlane.xlu0 %1369 }
 0x777   : > { %v1402_v25 = vsub.f32 %v1317_v62, %v1370_v34  ;;  %v1403_v27 = vsub.f32 %v1319_v26, %v1370_v34  ;;  %v1395_v26 = vsub.f32 %v2630_v4, %v1358_v57 }
 0x779   : > { %v1462_v21 = vmul.f32 1.442695, %v1402_v25  ;;  %v1464_v58 = vmul.f32 1.442695, %v1403_v27  ;;  %v1448_v42 = vmul.f32 1.442695, %v1395_v26 }
 0x77a   : > { %v1373_v3 = vpop.xlane.xlu0 %1372 }
 0x77b   : > { %1945 = vpow2.f32 %v1462_v21  ;;  %v1404_v20 = vsub.f32 %v1321_v49, %v1373_v3  ;;  %v1405_v53 = vsub.f32 %v1323_v37, %v1373_v3 }
 0x77c   : > { %1947 = vpow2.f32 %v1464_v58 }
 0x77d   : > { %v1466_v10 = vmul.f32 1.442695, %v1404_v20  ;;  %v1468_v54 = vmul.f32 1.442695, %v1405_v53 }
 0x77e   : > { %v1364_v31 = vpop.xlane.xlu0 %1363 }
 0x77f   : > { %1949 = vpow2.f32 %v1466_v10  ;;  %v1398_v8 = vsub.f32 %v1307_v15, %v1364_v31  ;;  %v1399_v59 = vsub.f32 %v1309_v28, %v1364_v31 }
 0x780   : > { %1951 = vpow2.f32 %v1468_v54 }
 0x781   : > { %v1454_v39 = vmul.f32 1.442695, %v1398_v8  ;;  %v1456_v62 = vmul.f32 1.442695, %v1399_v59 }
 0x782   : > { %v1367_v5 = vpop.xlane.xlu0 %1366 }
 0x783   : > { %1953 = vpow2.f32 %v1454_v39  ;;  %v1400_v49 = vsub.f32 %v2638_v50, %v1367_v5  ;;  %v1401_v37 = vsub.f32 %v2640_v40, %v1367_v5 }
 0x784   : > { %1955 = vpow2.f32 %v1456_v62 }
 0x785   : > { %v1458_v29 = vmul.f32 1.442695, %v1400_v49  ;;  %v1460_v38 = vmul.f32 1.442695, %v1401_v37 }
 0x786   : > { %v1361_v15 = vpop.xlane.xlu0 %1360 }
 0x787   : > { %1957 = vpow2.f32 %v1458_v29  ;;  %v1396_v28 = vsub.f32 %v2634_v45, %v1361_v15  ;;  %v1397_v2 = vsub.f32 %v2636_v12, %v1361_v15 }
 0x788   : > { %v2672_v41 = vpop.eup %1945  ;;  %1959 = vpow2.f32 %v1460_v38 }
 0x789   : > { %v2674_v4 = vpop.eup %1947  ;;  %1961 = vpow2.f32 %v1446_v24  ;;  %v1450_v50 = vmul.f32 1.442695, %v1396_v28  ;;  %v1452_v40 = vmul.f32 1.442695, %v1397_v2 }
 0x78a   : > { %1963 = vpow2.f32 %v1448_v42  ;;  %v1352_v14 = vpop.xlane.xlu0 %1351  ;;  %v1512_v44 = vadd.f32 %v2674_v4, %v2672_v41 }
 0x78b   : > { %v1390_v9 = vsub.f32 %v2620_v48, %v1352_v14  ;;  %v1391_v17 = vsub.f32 %v2622_v7, %v1352_v14  ;;  %1965 = vpow2.f32 %v1450_v50 }
 0x78c   : > { %v2680_v45 = vpop.eup %1949  ;;  %1513 = vadd.xlane.f32.xlu0 %v1512_v44  ;;  %1967 = vpow2.f32 %v1452_v40 }
 0x78d   : > { %v2682_v12 = vpop.eup %1951  ;;  %v1438_v34 = vmul.f32 1.442695, %v1390_v9  ;;  %v1440_v25 = vmul.f32 1.442695, %v1391_v17 }
 0x78e   : > { %v1355_v27 = vpop.xlane.xlu0 %1354  ;;  %v1515_v21 = vadd.f32 %v2682_v12, %v2680_v45 }
 0x78f   : > { %v1392_v58 = vsub.f32 %v2624_v6, %v1355_v27  ;;  %v1393_v3 = vsub.f32 %v2626_v55, %v1355_v27  ;;  %1969 = vpow2.f32 %v1438_v34 }
 0x790   : > { %v2688_v48 = vpop.eup %1953  ;;  %1516 = vadd.xlane.f32.xlu0 %v1515_v21  ;;  %1971 = vpow2.f32 %v1440_v25 }
 0x791   : > { %v2690_v7 = vpop.eup %1955  ;;  %v1442_v20 = vmul.f32 1.442695, %v1392_v58  ;;  %v1444_v53 = vmul.f32 1.442695, %v1393_v3 }
 0x792   : > { %v1346_v10 = vpop.xlane.xlu0 %1345  ;;  %v1506_v54 = vadd.f32 %v2690_v7, %v2688_v48 }
 0x793   : > { %v1386_v57 = vsub.f32 %v2612_v61, %v1346_v10  ;;  %v1387_v31 = vsub.f32 %v2614_v22, %v1346_v10  ;;  %1973 = vpow2.f32 %v1442_v20 }
 0x794   : > { %v2696_v6 = vpop.eup %1957  ;;  %1507 = vadd.xlane.f32.xlu0 %v1506_v54  ;;  %1975 = vpow2.f32 %v1444_v53 }
 0x795   : > { %v2698_v55 = vpop.eup %1959  ;;  %v1430_v8 = vmul.f32 1.442695, %v1386_v57  ;;  %v1432_v1 = vmul.f32 1.442695, %v1387_v31 }
 0x796   : > { %v2700_v59 = vpop.eup %1961  ;;  %v1349_v39 = vpop.xlane.xlu0 %1348  ;;  %v1509_v62 = vadd.f32 %v2698_v55, %v2696_v6 }
 0x797   : > { %v2704_v26 = vpop.eup %1963  ;;  %v1388_v61 = vsub.f32 %v2616_v23, %v1349_v39  ;;  %v1389_v22 = vsub.f32 %v2618_v43, %v1349_v39  ;;  %1977 = vpow2.f32 %v1430_v8 }
 0x798   : > { %1510 = vadd.xlane.f32.xlu0 %v1509_v62  ;;  %v2708_v49 = vpop.eup %1965  ;;  %1979 = vpow2.f32 %v1432_v1  ;;  %v1500_v29 = vadd.f32 %v2704_v26, %v2700_v59 }
 0x799   : > { %v1434_v5 = vmul.f32 1.442695, %v1388_v61  ;;  %v1436_v37 = vmul.f32 1.442695, %v1389_v22  ;;  %v2712_v38 = vpop.eup %1967 }
 0x79a   : > { %v1340_v24 = vpop.xlane.xlu0 %1339  ;;  %v1503_v50 = vadd.f32 %v2712_v38, %v2708_v49 }
 0x79b   : > { %v1382_v42 = vsub.f32 %v2604_v13, %v1340_v24  ;;  %v1383_v15 = vsub.f32 %v2606_v16, %v1340_v24  ;;  %1981 = vpow2.f32 %v1434_v5 }
 0x79c   : > { %1501 = vadd.xlane.f32.xlu0 %v1500_v29  ;;  %v2716_v43 = vpop.eup %1969  ;;  %1983 = vpow2.f32 %v1436_v37 }
 0x79d   : > { %v1422_v23 = vmul.f32 1.442695, %v1382_v42  ;;  %v1424_v28 = vmul.f32 1.442695, %v1383_v15  ;;  %v2720_v40 = vpop.eup %1971 }
 0x79e   : > { %v1343_v2 = vpop.xlane.xlu0 %1342  ;;  %v1494_v34 = vadd.f32 %v2720_v40, %v2716_v43 }
 0x79f   : > { %v1384_v14 = vsub.f32 %v2608_v63, %v1343_v2  ;;  %v1385_v44 = vsub.f32 %v2610_v52, %v1343_v2  ;;  %1985 = vpow2.f32 %v1422_v23 }
 0x7a0   : > { %1504 = vadd.xlane.f32.xlu0 %v1503_v50  ;;  %v2724_v16 = vpop.eup %1973  ;;  %1987 = vpow2.f32 %v1424_v28 }
 0x7a1   : > { %v1426_v13 = vmul.f32 1.442695, %v1384_v14  ;;  %v1428_v9 = vmul.f32 1.442695, %v1385_v44  ;;  %v2728_v25 = vpop.eup %1975 }
 0x7a2   : > { %v1334_v17 = vpop.xlane.xlu0 %1333  ;;  %v1497_v20 = vadd.f32 %v2728_v25, %v2724_v16 }
 0x7a3   : > { %v1378_v27 = vsub.f32 %v2596_v51, %v1334_v17  ;;  %v1379_v21 = vsub.f32 %v2598_v32, %v1334_v17  ;;  %1989 = vpow2.f32 %v1426_v13 }
 0x7a4   : > { %1495 = vadd.xlane.f32.xlu0 %v1494_v34  ;;  %v2732_v52 = vpop.eup %1977  ;;  %1991 = vpow2.f32 %v1428_v9 }
 0x7a5   : > { %v1414_v63 = vmul.f32 1.442695, %v1378_v27  ;;  %v1416_v58 = vmul.f32 1.442695, %v1379_v21  ;;  %v2736_v53 = vpop.eup %1979 }
 0x7a6   : > { %v1337_v3 = vpop.xlane.xlu0 %1336  ;;  %v1488_v8 = vadd.f32 %v2736_v53, %v2732_v52 }
 0x7a7   : > { %v1380_v10 = vsub.f32 %v2600_v56, %v1337_v3  ;;  %v1381_v54 = vsub.f32 %v2602_v19, %v1337_v3  ;;  %1993 = vpow2.f32 %v1414_v63  ;;  %v663_v63 = vld [vmem:[%s2865_s5 + $0x8] sm:$0xff]  ;;  %v664_v3 = vld [vmem:[%s2865_s5 + $0x10] sm:$0xff] }
 0x7a8   : > { %1498 = vadd.xlane.f32.xlu0 %v1497_v20  ;;  %v2740_v57 = vpop.eup %1981  ;;  %1995 = vpow2.f32 %v1416_v58  ;;  %v662_v58 = vld [vmem:[%s2865_s5] sm:$0xff]  ;;  %v665_v20 = vld [vmem:[%s2865_s5 + $0x18] sm:$0xff] }
 0x7a9   : > { %v1418_v51 = vmul.f32 1.442695, %v1380_v10  ;;  %v1420_v32 = vmul.f32 1.442695, %v1381_v54  ;;  %v2744_v1 = vpop.eup %1983 }
 0x7aa   : > { %v1328_v31 = vpop.xlane.xlu0 %1327  ;;  %v1491_v5 = vadd.f32 %v2744_v1, %v2740_v57 }
 0x7ab   : > { %1997 = vpow2.f32 %v1418_v51  ;;  %v1374_v39 = vsub.f32 %v2588_v47, %v1328_v31  ;;  %v1375_v56 = vsub.f32 %v2590_v35, %v1328_v31 }
 0x7ac   : > { %1999 = vpow2.f32 %v1420_v32  ;;  %1489 = vadd.xlane.f32.xlu0 %v1488_v8  ;;  %v2748_v61 = vpop.eup %1985 }
 0x7ad   : > { %v1406_v19 = vmul.f32 1.442695, %v1374_v39  ;;  %v1408_v62 = vmul.f32 1.442695, %v1375_v56  ;;  %v2752_v37 = vpop.eup %1987 }
 0x7ae   : > { %v1331_v22 = vpop.xlane.xlu0 %1330  ;;  %v1482_v15 = vadd.f32 %v2752_v37, %v2748_v61 }
 0x7af   : > { %2001 = vpow2.f32 %v1406_v19  ;;  %v1376_v24 = vsub.f32 %v2592_v36, %v1331_v22  ;;  %v1377_v29 = vsub.f32 %v2594_v30, %v1331_v22 }
 0x7b0   : > { %2003 = vpow2.f32 %v1408_v62  ;;  %1492 = vadd.xlane.f32.xlu0 %v1491_v5  ;;  %v2756_v42 = vpop.eup %1989 }
 0x7b1   : > { %v1410_v47 = vmul.f32 1.442695, %v1376_v24  ;;  %v1412_v35 = vmul.f32 1.442695, %v1377_v29  ;;  %v2760_v23 = vpop.eup %1991 }
 0x7b2   : > { %v1485_v36 = vadd.f32 %v2760_v23, %v2756_v42 }
 0x7b3   : > { %2005 = vpow2.f32 %v1410_v47 }
 0x7b4   : > { %2007 = vpow2.f32 %v1412_v35  ;;  %1483 = vadd.xlane.f32.xlu0 %v1482_v15  ;;  %v2762_v28 = vpop.eup %1993 }
 0x7b5   : > { %v2766_v30 = vpop.eup %1995 }
 0x7b6   : > { %v1476_v44 = vadd.f32 %v2766_v30, %v2762_v28 }
 0x7b8   : > { %v2768_v2 = vpop.eup %1997  ;;  %1486 = vadd.xlane.f32.xlu0 %v1485_v36 }
 0x7b9   : > { %v2770_v50 = vpop.eup %1999 }
 0x7ba   : > { %v1479_v14 = vadd.f32 %v2770_v50, %v2768_v2 }
 0x7bc   : > { %v2776_v13 = vpop.eup %2001  ;;  %1480 = vadd.xlane.f32.xlu1 %v1479_v14  ;;  %1477 = vadd.xlane.f32.xlu0 %v1476_v44 }
 0x7bd   : > { %v2778_v9 = vpop.eup %2003 }
 0x7be   : > { %v1470_v17 = vadd.f32 %v2778_v9, %v2776_v13 }
 0x7c0   : > { %v2782_v34 = vpop.eup %2005  ;;  %1471 = vadd.xlane.f32.xlu0 %v1470_v17 }
 0x7c1   : > { %v2784_v27 = vpop.eup %2007 }
 0x7c2   : > { %v1473_v21 = vadd.f32 %v2784_v27, %v2782_v34 }
 0x7c4   : > { %1474 = vadd.xlane.f32.xlu1 %v1473_v21 }
 0x7d5   : > { %1109 = vperm.xlu1 %1832, %v663_v63  }
 0x7d6   : > { %1104 = vperm.xlu0 %1831, %v662_v58  }
 0x7d9   : > { %1114 = vperm.xlu1 %1832, %v664_v3  }
 0x7da   : > { %1119 = vperm.xlu0 %1831, %v665_v20  }
 0x815   : > { %v1514_v10 = vpop.xlane.xlu0 %1513 }
 0x816   : > { %2009 = vrcp.f32 %v1514_v10 }
 0x819   : > { %v1517_v54 = vpop.xlane.xlu0 %1516 }
 0x81a   : > { %2011 = vrcp.f32 %v1517_v54 }
 0x81d   : > { %v1508_v51 = vpop.xlane.xlu0 %1507 }
 0x81e   : > { %2013 = vrcp.f32 %v1508_v51 }
 0x821   : > { %v1511_v32 = vpop.xlane.xlu0 %1510 }
 0x822   : > { %2015 = vrcp.f32 %v1511_v32 }
 0x823   : > { %v2010_v31 = vpop.eup %2009 }
 0x824   : > { %v1563_v56 = vmul.f32 %v2010_v31, %v2674_v4  ;;  %v1562_v62 = vmul.f32 %v2010_v31, %v2672_v41 }
 0x825   : > { %v1502_v8 = vpop.xlane.xlu0 %1501 }
 0x826   : > { %2017 = vrcp.f32 %v1502_v8 }
 0x827   : > { %v2012_v39 = vpop.eup %2011 }
 0x828   : > { %v1565_v19 = vmul.f32 %v2012_v39, %v2682_v12  ;;  %v1564_v22 = vmul.f32 %v2012_v39, %v2680_v45 }
 0x829   : > { %v1505_v5 = vpop.xlane.xlu0 %1504 }
 0x82a   : > { %2019 = vrcp.f32 %v1505_v5  ;;  %v1581_v24 = vpack.c.bf16 %v1565_v19, %v1563_v56  ;;  %v1580_v29 = vpack.c.bf16 %v1564_v22, %v1562_v62 }
 0x82b   : > { %v2014_v47 = vpop.eup %2013 }
 0x82c   : > { %1582 = vmatprep.subr.bf16.mxu0 %v1581_v24  ;;  %v1559_v36 = vmul.f32 %v2014_v47, %v2690_v7  ;;  %v1558_v12 = vmul.f32 %v2014_v47, %v2688_v48 }
 0x82d   : > { %1583 = vmatpush1.bf16.xpose.msra.mxu0 %v1580_v29  ;;  %v1496_v35 = vpop.xlane.xlu0 %1495 }
 0x82e   : > { %2021 = vrcp.f32 %v1496_v35 }
 0x82f   : > { %v2016_v15 = vpop.eup %2015 }
 0x830   : > { %v1561_v4 = vmul.f32 %v2016_v15, %v2698_v55  ;;  %v1560_v41 = vmul.f32 %v2016_v15, %v2696_v6 }
 0x831   : > { %v1499_v14 = vpop.xlane.xlu0 %1498 }
 0x832   : > { %2023 = vrcp.f32 %v1499_v14  ;;  %v1579_v45 = vpack.c.bf16 %v1561_v4, %v1559_v36  ;;  %v1578_v44 = vpack.c.bf16 %v1560_v41, %v1558_v12 }
 0x833   : > { %v2018_v17 = vpop.eup %2017 }
 0x834   : > { %1584 = vmatprep.subr.bf16.mxu0 %v1579_v45  ;;  %v1555_v58 = vmul.f32 %v2018_v17, %v2704_v26  ;;  %v1554_v55 = vmul.f32 %v2018_v17, %v2700_v59 }
 0x835   : > { %1585 = vmatpush1.bf16.xpose.msra.mxu0 %v1578_v44  ;;  %v1490_v21 = vpop.xlane.xlu0 %1489 }
 0x836   : > { %2025 = vrcp.f32 %v1490_v21 }
 0x837   : > { %v2020_v63 = vpop.eup %2019 }
 0x838   : > { %v1557_v7 = vmul.f32 %v2020_v63, %v2712_v38  ;;  %v1556_v48 = vmul.f32 %v2020_v63, %v2708_v49 }
 0x839   : > { %v1493_v3 = vpop.xlane.xlu0 %1492 }
 0x83a   : > { %2027 = vrcp.f32 %v1493_v3  ;;  %v1577_v6 = vpack.c.bf16 %v1557_v7, %v1555_v58  ;;  %v1576_v20 = vpack.c.bf16 %v1556_v48, %v1554_v55 }
 0x83b   : > { %v2022_v10 = vpop.eup %2021 }
 0x83c   : > { %1586 = vmatprep.subr.bf16.mxu0 %v1577_v6  ;;  %v1551_v32 = vmul.f32 %v2022_v10, %v2720_v40  ;;  %v1550_v38 = vmul.f32 %v2022_v10, %v2716_v43 }
 0x83d   : > { %1587 = vmatpush1.bf16.xpose.msra.mxu0 %v1576_v20  ;;  %v1484_v54 = vpop.xlane.xlu0 %1483 }
 0x83e   : > { %2029 = vrcp.f32 %v1484_v54 }
 0x83f   : > { %v2024_v51 = vpop.eup %2023 }
 0x840   : > { %v1553_v26 = vmul.f32 %v2024_v51, %v2728_v25  ;;  %v1552_v59 = vmul.f32 %v2024_v51, %v2724_v16 }
 0x841   : > { %v1487_v31 = vpop.xlane.xlu0 %1486 }
 0x842   : > { %2031 = vrcp.f32 %v1487_v31  ;;  %v1575_v49 = vpack.c.bf16 %v1553_v26, %v1551_v32  ;;  %v1574_v8 = vpack.c.bf16 %v1552_v59, %v1550_v38 }
 0x843   : > { %v2026_v39 = vpop.eup %2025 }
 0x844   : > { %1588 = vmatprep.subr.bf16.mxu0 %v1575_v49  ;;  %v1547_v40 = vmul.f32 %v2026_v39, %v2736_v53  ;;  %v1546_v43 = vmul.f32 %v2026_v39, %v2732_v52 }
 0x845   : > { %1589 = vmatpush1.bf16.xpose.msra.mxu0 %v1574_v8  ;;  %v1478_v56 = vpop.xlane.xlu0 %1477  ;;  %v1481_v19 = vpop.xlane.xlu1 %1480 }
 0x846   : > { %2033 = vrcp.f32 %v1478_v56 }
 0x847   : > { %v2028_v62 = vpop.eup %2027  ;;  %2035 = vrcp.f32 %v1481_v19 }
 0x848   : > { %v1549_v25 = vmul.f32 %v2028_v62, %v2744_v1  ;;  %v1548_v16 = vmul.f32 %v2028_v62, %v2740_v57 }
 0x849   : > { %v1472_v22 = vpop.xlane.xlu0 %1471 }
 0x84a   : > { %v1573_v5 = vpack.c.bf16 %v1549_v25, %v1547_v40  ;;  %v1572_v24 = vpack.c.bf16 %v1548_v16, %v1546_v43  ;;  %2037 = vrcp.f32 %v1472_v22 }
 0x84b   : > { %v2030_v29 = vpop.eup %2029 }
 0x84c   : > { %1590 = vmatprep.subr.bf16.mxu0 %v1573_v5  ;;  %v1543_v15 = vmul.f32 %v2030_v29, %v2752_v37  ;;  %v1542_v1 = vmul.f32 %v2030_v29, %v2748_v61 }
 0x84d   : > { %1591 = vmatpush1.bf16.xpose.msra.mxu0 %v1572_v24  ;;  %v1475_v47 = vpop.xlane.xlu1 %1474 }
 0x84e   : > { %2039 = vrcp.f32 %v1475_v47 }
 0x84f   : > { %v2032_v35 = vpop.eup %2031 }
 0x850   : > { %v1545_v53 = vmul.f32 %v2032_v35, %v2760_v23  ;;  %v1544_v52 = vmul.f32 %v2032_v35, %v2756_v42 }
 0x851   : > { %v1105_v57 = vpop.permute.xlu0 %1104  ;;  %v2824_v36 = vpop.permute.xlu1 %1109 }
 0x852   : > { %v1163_v4 = vadd.f32 %v2582_v11, %v1105_v57  ;;  %v1166_v12 = vadd.f32 %v2586_v46, %v2824_v36  ;;  %v1571_v41 = vpack.c.bf16 %v1545_v53, %v1543_v15  ;;  %v1570_v14 = vpack.c.bf16 %v1544_v52, %v1542_v1 }
 0x853   : > { %v2034_v45 = vpop.eup %2033 }
 0x854   : > { %v2036_v44 = vpop.eup %2035  ;;  %v1177_v37 = vmax.f32 %v1163_v4, 0.0  ;;  %v1178_v17 = vmax.f32 %v1166_v12, 0.0  ;;  %1592 = vmatprep.subr.bf16.mxu0 %v1571_v41  ;;  %v1539_v23 = vmul.f32 %v2034_v45, %v2766_v30  ;;  %v1538_v7 = vmul.f32 %v2034_v45, %v2762_v28 }
 0x855   : > { %1593 = vmatpush1.bf16.xpose.msra.mxu0 %v1570_v14  ;;  %v1120_v11 = vpop.permute.xlu0 %1119  ;;  %v1115_v61 = vpop.permute.xlu1 %1114  ;;  %v1541_v46 = vmul.f32 %v2036_v44, %v2770_v50  ;;  %v1540_v55 = vmul.f32 %v2036_v44, %v2768_v2 }
 0x856   : > { %v1181_v42 = vmin.f32 %v1177_v37, 6.0  ;;  %v1182_v21 = vmin.f32 %v1178_v17, 6.0  ;;  %v1174_v63 = vadd.f32 %v2584_v0, %v1120_v11  ;;  %v1171_v30 = vadd.f32 %v2580_v18, %v1115_v61 }
 0x857   : > { %v1569_v58 = vpack.c.bf16 %v1541_v46, %v1539_v23  ;;  %v2038_v6 = vpop.eup %2037  ;;  %v1568_v54 = vpack.c.bf16 %v1540_v55, %v1538_v7 }
 0x858   : > { %1185 = vst [vmem:[%s2834_s28] sm:$0xff] %v1181_v42  ;;  %1186 = vst [vmem:[%s2834_s28 + $0x10] sm:$0xff] %v1182_v21  ;;  %v1180_v48 = vmax.f32 %v1174_v63, 0.0  ;;  %v1179_v3 = vmax.f32 %v1171_v30, 0.0  ;;  %v1535_v0 = vmul.f32 %v2038_v6, %v2778_v9  ;;  %v1534_v51 = vmul.f32 %v2038_v6, %v2776_v13 }
 0x859   : > { %1594 = vmatprep.subr.bf16.mxu0 %v1569_v58 }
 0x85a   : > { %v1184_v50 = vmin.f32 %v1180_v48, 6.0  ;;  %v1183_v20 = vmin.f32 %v1179_v3, 6.0 }
 0x85b   : > { %v2040_v10 = vpop.eup %2039 }
 0x85c   : > { %1188 = vst [vmem:[%s2834_s28 + $0x30] sm:$0xff] %v1184_v50  ;;  %1187 = vst [vmem:[%s2834_s28 + $0x20] sm:$0xff] %v1183_v20  ;;  %v1537_v18 = vmul.f32 %v2040_v10, %v2784_v27  ;;  %v1536_v2 = vmul.f32 %v2040_v10, %v2782_v34 }
 0x85d   : > { %1595 = vmatpush1.bf16.xpose.msra.mxu0 %v1568_v54 }
 0x85e   : > { %v1567_v28 = vpack.c.bf16 %v1537_v18, %v1535_v0  ;;  %v1566_v32 = vpack.c.bf16 %v1536_v2, %v1534_v51 }
 0x860   : > { %1596 = vmatprep.subr.bf16.mxu0 %v1567_v28 }
 0x865   : > { %1597 = vmatpush1.bf16.xpose.msra.mxu0 %v1566_v32 }
 0x86c   : > { %1615 = vmatmul.mubr.bf16.vlgmr.msra.gmra.mxu0 %v2540_v33 }
 0x92c   : > { %v1616_v26 = vpop.f32.mrf.mxu0 }
 0x92e   : > { %v1618_v38 = vpop.f32.mrf.mxu0 }
 0x930   : > { %v1619_v59 = vpop.f32.mrf.mxu0 }
 0x931   : > { %v1623_v31 = vpack.c.bf16 %v1619_v59, %v1616_v26 }
 0x932   : > { %v1621_v49 = vpop.f32.mrf.mxu0 }
 0x933   : > { %1803 = vmatprep.subr.bf16.mxu1 %v1623_v31 }
 0x934   : > { %1804 = vmatpush3.bf16.msra.mxu1 %v1623_v31 }
 0x937   : > { %1806 = vmatmul.mubr.msk.bf16.vlgmr.msra.gmra.mxu1 %vm666_vm1, %v2557_v60 }
 0x9f7   : > { %v1807_v9 = vpop.f32.mrf.mxu1 }
 0x9f8   : > { %v1667_v34 = vadd.f32 %v1807_v9, %v1115_v61 }
 0x9f9   : > { %v1658_v13 = vpop.f32.mrf.mxu1 }
 0x9fa   : > { %v1675_v27 = vmax.f32 %v1667_v34, 0.0  ;;  %v1659_v8 = vadd.f32 %v1658_v13, %v1105_v57 }
 0x9fb   : > { %v1808_v33 = vpop.f32.mrf.mxu1 }
 0x9fc   : > { %v1679_v39 = vmin.f32 %v1675_v27, 6.0  ;;  %v1673_v56 = vmax.f32 %v1659_v8, 0.0  ;;  %v1670_v19 = vadd.f32 %v1808_v33, %v1120_v11 }
 0x9fd   : > { %v1661_v62 = vpop.f32.mrf.mxu1 }
 0x9fe   : > { %1683 = vst [vmem:[%s2834_s28 + $0x28] sm:$0xff] %v1679_v39  ;;  %v1677_v40 = vmin.f32 %v1673_v56, 6.0  ;;  %v1676_v25 = vmax.f32 %v1670_v19, 0.0  ;;  %v1662_v43 = vadd.f32 %v1661_v62, %v2824_v36 }
 0xa00   : > { %1681 = vst [vmem:[%s2834_s28 + $0x8] sm:$0xff] %v1677_v40  ;;  %v1680_v16 = vmin.f32 %v1676_v25, 6.0  ;;  %v1674_v60 = vmax.f32 %v1662_v43, 0.0 }
 0xa02   : > { %1684 = vst [vmem:[%s2834_s28 + $0x38] sm:$0xff] %v1680_v16  ;;  %v1678_v22 = vmin.f32 %v1674_v60, 6.0 }
 0xa04   : > { %1682 = vst [vmem:[%s2834_s28 + $0x18] sm:$0xff] %v1678_v22 }
 0xa05 PF: > { %s16_s21 = sadd.s32 1, %s2047_s21  }
 0xa06   : > { %p13_p4 = scmp.ge.s32.totalorder %s16_s21, 4  }
 0xa08   :  { %15 = sbr.rel (!%p13_p4) target bundleno = 1 (0x1), region = 77 }

</bundles_post_ra>
